<compile_context>
chip_gen: v7x
topology: tpu7x:2x2x1
jax: 0.10.0
libtpu: 0.0.40
codegen_flags: <defaults>
</compile_context>

<pallas_src>
import functools

import jax
import jax.numpy as jnp
from jax import lax
from jax.experimental import pallas as pl
from jax.experimental.pallas import tpu as pltpu


# ----------------------------------------------------------------------------
# Fused Pallas kernel: all GRU layers + final FC in one invocation
# ----------------------------------------------------------------------------
def _weather_gru_fused_kernel(num_layers, seq_len, batch, x_ref, *refs):
    """Fused multi-layer GRU + FC.  Single invocation (no grid).

    x_ref: (T*B, D_in0)   time-major input, flattened over (T, B)
    per layer l:
        wih  (3, D_in_l, H)  transposed per-gate input->hidden weights (r,z,n)
        whh  (3, H, H)       transposed per-gate hidden->hidden weights
        b_gi (3, 1, H)       hoisted biases: [b_ir+b_hr, b_iz+b_hz, b_in]
        b_hn (1, H)          hidden bias of the "new" gate (stays inside r*(.))
    then: fc_w (H, O), fc_b (1, O)
    out_ref: (B, O)
    act_ref: (T*B, H) VMEM scratch holding the inter-layer activations
    """
    T, B = seq_len, batch
    n_w = 4 * num_layers
    layer_refs = refs[:n_w]
    fc_w_ref, fc_b_ref, out_ref, act_ref = refs[n_w:]

    x2d = x_ref[...]                                    # (T*B, D_in0) f32
    h = None
    for l in range(num_layers):
        wih_ref, whh_ref, bgi_ref, bhn_ref = layer_refs[4 * l:4 * l + 4]
        H = wih_ref.shape[2]
        if l > 0:
            # previous layer's full sequence of hidden states (already in VMEM)
            x2d = act_ref[...]

        # Hoisted input projection: one matmul per gate for ALL timesteps.
        # Off the serial critical path; uses the full (T*B) row extent of the
        # MXU instead of B rows per step.
        gi_r = jnp.dot(x2d, wih_ref[0],
                       preferred_element_type=jnp.float32) + bgi_ref[0]
        gi_z = jnp.dot(x2d, wih_ref[1],
                       preferred_element_type=jnp.float32) + bgi_ref[1]
        gi_n = jnp.dot(x2d, wih_ref[2],
                       preferred_element_type=jnp.float32) + bgi_ref[2]

        w_r, w_z, w_n = whh_ref[0], whh_ref[1], whh_ref[2]
        b_hn = bhn_ref[...]                             # (1, H)

        h = jnp.zeros((B, H), jnp.float32)
        for t in range(T):              # static T -> fully unrolled recurrence
            lo = t * B
            gh_r = jnp.dot(h, w_r, preferred_element_type=jnp.float32)
            gh_z = jnp.dot(h, w_z, preferred_element_type=jnp.float32)
            gh_n = jnp.dot(h, w_n, preferred_element_type=jnp.float32) + b_hn
            r = jax.nn.sigmoid(gi_r[lo:lo + B] + gh_r)
            z = jax.nn.sigmoid(gi_z[lo:lo + B] + gh_z)
            n = jnp.tanh(gi_n[lo:lo + B] + r * gh_n)
            h = (1.0 - z) * n + z * h
            if l + 1 < num_layers:
                act_ref[lo:lo + B, :] = h               # next layer's input

    # Final Linear on the last timestep of the last layer (torch: out[:, -1]).
    out_ref[...] = (jnp.dot(h, fc_w_ref[...],
                            preferred_element_type=jnp.float32)
                    + fc_b_ref[...]).astype(out_ref.dtype)


# ----------------------------------------------------------------------------
# Parameter preparation (one-time: transpose / split per gate / fold biases)
# ----------------------------------------------------------------------------
def prepare_params(params):
    """Convert PyTorch-layout params to the kernel layout once (not per call)."""
    layers = []
    for layer in params["gru"]:
        w_ih, w_hh = layer["w_ih"], layer["w_hh"]       # (3H, D_in), (3H, H)
        b_ih, b_hh = layer["b_ih"], layer["b_hh"]       # (3H,), (3H,)
        H = w_hh.shape[1]
        d_in = w_ih.shape[1]
        wih = jnp.transpose(w_ih.reshape(3, H, d_in), (0, 2, 1)).astype(jnp.float32)
        whh = jnp.transpose(w_hh.reshape(3, H, H), (0, 2, 1)).astype(jnp.float32)
        b_ih3 = b_ih.reshape(3, 1, H).astype(jnp.float32)
        b_hh3 = b_hh.reshape(3, 1, H).astype(jnp.float32)
        # r,z: hidden bias folds into the hoisted input projection.
        # n: b_hn must stay inside r * (h@W_hn + b_hn).
        b_gi = b_ih3.at[0:2].add(b_hh3[0:2])            # (3, 1, H)
        b_hn = b_hh3[2]                                 # (1, H)
        layers.append((wih, whh, b_gi, b_hn))
    return {
        "layers": layers,
        "fc_w": jnp.transpose(params["fc_w"]).astype(jnp.float32),   # (H, O)
        "fc_b": params["fc_b"].reshape(1, -1).astype(jnp.float32),   # (1, O)
    }


# ----------------------------------------------------------------------------
# Forward wrapper
# ----------------------------------------------------------------------------
@jax.jit
def weather_gru_forward(x, prepped):
    """x: (B, T, input_size) batch_first -> (B, output_size)."""
    B, T, D = x.shape
    num_layers = len(prepped["layers"])
    H = prepped["layers"][0][1].shape[-1]
    O = prepped["fc_w"].shape[1]

    # time-major, flattened to (T*B, D) so the hoisted per-layer input
    # projection is a single dense matmul over all timesteps.
    x2d = jnp.transpose(x, (1, 0, 2)).reshape(T * B, D).astype(jnp.float32)

    flat = []
    for wih, whh, b_gi, b_hn in prepped["layers"]:
        flat += [wih, whh, b_gi, b_hn]

    kernel = functools.partial(_weather_gru_fused_kernel, num_layers, T, B)
    return pl.pallas_call(
        kernel,
        out_shape=jax.ShapeDtypeStruct((B, O), jnp.float32),
        scratch_shapes=[pltpu.VMEM((T * B, H), jnp.float32)],
    )(x2d, *flat, prepped["fc_w"], prepped["fc_b"])


# ----------------------------------------------------------------------------
# Pure-JAX reference (same math as torch.nn.GRU, gate order r,z,n)
# ----------------------------------------------------------------------------
def weather_gru_ref(x, params):
    B = x.shape[0]
    seq = jnp.transpose(x, (1, 0, 2))
    for layer in params["gru"]:
        H = layer["w_hh"].shape[1]

        def step(h, x_t, layer=layer, H=H):
            gi = x_t @ layer["w_ih"].T + layer["b_ih"]
            gh = h @ layer["w_hh"].T + layer["b_hh"]
            r = jax.nn.sigmoid(gi[:, :H] + gh[:, :H])
            z = jax.nn.sigmoid(gi[:, H:2 * H] + gh[:, H:2 * H])
            n = jnp.tanh(gi[:, 2 * H:] + r * gh[:, 2 * H:])
            h_new = (1.0 - z) * n + z * h
            return h_new, h_new

        h0 = jnp.zeros((B, H), jnp.float32)
        _, seq = lax.scan(step, h0, seq)
    return seq[-1] @ params["fc_w"].T + params["fc_b"]


# ----------------------------------------------------------------------------
# Deterministic parameter init (PyTorch-style uniform(-1/sqrt(H), 1/sqrt(H)))
# ----------------------------------------------------------------------------
def init_params(key, input_size, hidden_size, output_size, num_layers):
    bound = 1.0 / jnp.sqrt(hidden_size)
    layers = []
    for l in range(num_layers):
        d_in = input_size if l == 0 else hidden_size
        key, k1, k2, k3, k4 = jax.random.split(key, 5)
        layers.append({
            "w_ih": jax.random.uniform(k1, (3 * hidden_size, d_in),
                                       jnp.float32, -bound, bound),
            "w_hh": jax.random.uniform(k2, (3 * hidden_size, hidden_size),
                                       jnp.float32, -bound, bound),
            "b_ih": jax.random.uniform(k3, (3 * hidden_size,),
                                       jnp.float32, -bound, bound),
            "b_hh": jax.random.uniform(k4, (3 * hidden_size,),
                                       jnp.float32, -bound, bound),
        })
    key, k5, k6 = jax.random.split(key, 3)
    params = {
        "gru": layers,
        "fc_w": jax.random.uniform(k5, (output_size, hidden_size),
                                   jnp.float32, -bound, bound),
        "fc_b": jax.random.uniform(k6, (output_size,),
                                   jnp.float32, -bound, bound),
    }
    return params


# ----------------------------------------------------------------------------
if __name__ == "__main__":
    batch, seq_len = 2, 8
    input_size, hidden_size, output_size, num_layers = 4, 32, 4, 2

    key = jax.random.PRNGKey(0)
    key, kx = jax.random.split(key)
    x = jax.random.normal(kx, (batch, seq_len, input_size), jnp.float32)
    params = init_params(key, input_size, hidden_size, output_size, num_layers)
    prepped = prepare_params(params)

    out = jax.block_until_ready(weather_gru_forward(x, prepped))
    assert out.shape == (batch, output_size)

    ref = jax.block_until_ready(weather_gru_ref(x, params))
    assert jnp.allclose(out, ref, atol=1e-3, rtol=1e-3), (out, ref)

    print("KERNEL_OK")
</pallas_src>

<mosaic_0001>
module attributes {stable_mosaic.version = 11 : i64} {
  func.func @_weather_gru_fused_kernel(%arg0: memref<16x4xf32, #tpu.memory_space<vmem>>, %arg1: memref<3x4x32xf32, #tpu.memory_space<vmem>>, %arg2: memref<3x32x32xf32, #tpu.memory_space<vmem>>, %arg3: memref<3x1x32xf32, #tpu.memory_space<vmem>>, %arg4: memref<1x32xf32, #tpu.memory_space<vmem>>, %arg5: memref<3x32x32xf32, #tpu.memory_space<vmem>>, %arg6: memref<3x32x32xf32, #tpu.memory_space<vmem>>, %arg7: memref<3x1x32xf32, #tpu.memory_space<vmem>>, %arg8: memref<1x32xf32, #tpu.memory_space<vmem>>, %arg9: memref<32x4xf32, #tpu.memory_space<vmem>>, %arg10: memref<1x4xf32, #tpu.memory_space<vmem>>, %arg11: memref<2x4xf32, #tpu.memory_space<vmem>>, %arg12: memref<16x32xf32, #tpu.memory_space<vmem>>) attributes {dimension_semantics = [], scalar_prefetch = 0 : i64, scratch_operands = 1 : i64, tpu.core_type = #tpu.core_type<tc>} {
    %c0 = arith.constant 0 : index
    %c0_0 = arith.constant 0 : index
    %0 = vector.load %arg0[%c0, %c0_0] : memref<16x4xf32, #tpu.memory_space<vmem>>, vector<16x4xf32>
    %c0_1 = arith.constant 0 : index
    %c0_2 = arith.constant 0 : index
    %c0_3 = arith.constant 0 : index
    %1 = vector.load %arg1[%c0_1, %c0_2, %c0_3] : memref<3x4x32xf32, #tpu.memory_space<vmem>>, vector<1x4x32xf32>
    %2 = vector.shape_cast %1 : vector<1x4x32xf32> to vector<4x32xf32>
    %cst = arith.constant dense<0.000000e+00> : vector<16x32xf32>
    %3 = tpu.matmul %0, %2, %cst {dimension_numbers = #tpu.dot_dimension_numbers<[1], [0], [0], [1], [0, 0, 1, 1], [], []>} : vector<16x4xf32>, vector<4x32xf32>, vector<16x32xf32> -> vector<16x32xf32>
    %c0_4 = arith.constant 0 : index
    %c0_5 = arith.constant 0 : index
    %c0_6 = arith.constant 0 : index
    %4 = vector.load %arg3[%c0_4, %c0_5, %c0_6] : memref<3x1x32xf32, #tpu.memory_space<vmem>>, vector<1x1x32xf32>
    %5 = vector.shape_cast %4 : vector<1x1x32xf32> to vector<1x32xf32>
    %6 = vector.broadcast %5 : vector<1x32xf32> to vector<16x32xf32>
    %7 = arith.addf %3, %6 : vector<16x32xf32>
    %c1 = arith.constant 1 : index
    %c0_7 = arith.constant 0 : index
    %c0_8 = arith.constant 0 : index
    %8 = vector.load %arg1[%c1, %c0_7, %c0_8] : memref<3x4x32xf32, #tpu.memory_space<vmem>>, vector<1x4x32xf32>
    %9 = vector.shape_cast %8 : vector<1x4x32xf32> to vector<4x32xf32>
    %cst_9 = arith.constant dense<0.000000e+00> : vector<16x32xf32>
    %10 = tpu.matmul %0, %9, %cst_9 {dimension_numbers = #tpu.dot_dimension_numbers<[1], [0], [0], [1], [0, 0, 1, 1], [], []>} : vector<16x4xf32>, vector<4x32xf32>, vector<16x32xf32> -> vector<16x32xf32>
    %c1_10 = arith.constant 1 : index
    %c0_11 = arith.constant 0 : index
    %c0_12 = arith.constant 0 : index
    %11 = vector.load %arg3[%c1_10, %c0_11, %c0_12] : memref<3x1x32xf32, #tpu.memory_space<vmem>>, vector<1x1x32xf32>
    %12 = vector.shape_cast %11 : vector<1x1x32xf32> to vector<1x32xf32>
    %13 = vector.broadcast %12 : vector<1x32xf32> to vector<16x32xf32>
    %14 = arith.addf %10, %13 : vector<16x32xf32>
    %c2 = arith.constant 2 : index
    %c0_13 = arith.constant 0 : index
    %c0_14 = arith.constant 0 : index
    %15 = vector.load %arg1[%c2, %c0_13, %c0_14] : memref<3x4x32xf32, #tpu.memory_space<vmem>>, vector<1x4x32xf32>
    %16 = vector.shape_cast %15 : vector<1x4x32xf32> to vector<4x32xf32>
    %cst_15 = arith.constant dense<0.000000e+00> : vector<16x32xf32>
    %17 = tpu.matmul %0, %16, %cst_15 {dimension_numbers = #tpu.dot_dimension_numbers<[1], [0], [0], [1], [0, 0, 1, 1], [], []>} : vector<16x4xf32>, vector<4x32xf32>, vector<16x32xf32> -> vector<16x32xf32>
    %c2_16 = arith.constant 2 : index
    %c0_17 = arith.constant 0 : index
    %c0_18 = arith.constant 0 : index
    %18 = vector.load %arg3[%c2_16, %c0_17, %c0_18] : memref<3x1x32xf32, #tpu.memory_space<vmem>>, vector<1x1x32xf32>
    %19 = vector.shape_cast %18 : vector<1x1x32xf32> to vector<1x32xf32>
    %20 = vector.broadcast %19 : vector<1x32xf32> to vector<16x32xf32>
    %21 = arith.addf %17, %20 : vector<16x32xf32>
    %c0_19 = arith.constant 0 : index
    %c0_20 = arith.constant 0 : index
    %c0_21 = arith.constant 0 : index
    %22 = vector.load %arg2[%c0_19, %c0_20, %c0_21] : memref<3x32x32xf32, #tpu.memory_space<vmem>>, vector<1x32x32xf32>
    %23 = vector.shape_cast %22 : vector<1x32x32xf32> to vector<32x32xf32>
    %c1_22 = arith.constant 1 : index
    %c0_23 = arith.constant 0 : index
    %c0_24 = arith.constant 0 : index
    %24 = vector.load %arg2[%c1_22, %c0_23, %c0_24] : memref<3x32x32xf32, #tpu.memory_space<vmem>>, vector<1x32x32xf32>
    %25 = vector.shape_cast %24 : vector<1x32x32xf32> to vector<32x32xf32>
    %c2_25 = arith.constant 2 : index
    %c0_26 = arith.constant 0 : index
    %c0_27 = arith.constant 0 : index
    %26 = vector.load %arg2[%c2_25, %c0_26, %c0_27] : memref<3x32x32xf32, #tpu.memory_space<vmem>>, vector<1x32x32xf32>
    %27 = vector.shape_cast %26 : vector<1x32x32xf32> to vector<32x32xf32>
    %c0_28 = arith.constant 0 : index
    %c0_29 = arith.constant 0 : index
    %28 = vector.load %arg4[%c0_28, %c0_29] : memref<1x32xf32, #tpu.memory_space<vmem>>, vector<1x32xf32>
    %cst_30 = arith.constant 0.000000e+00 : f32
    %29 = vector.broadcast %cst_30 : f32 to vector<2x32xf32>
    %cst_31 = arith.constant dense<0.000000e+00> : vector<2x32xf32>
    %30 = tpu.matmul %29, %23, %cst_31 {dimension_numbers = #tpu.dot_dimension_numbers<[1], [0], [0], [1], [0, 0, 1, 1], [], []>} : vector<2x32xf32>, vector<32x32xf32>, vector<2x32xf32> -> vector<2x32xf32>
    %cst_32 = arith.constant dense<0.000000e+00> : vector<2x32xf32>
    %31 = tpu.matmul %29, %25, %cst_32 {dimension_numbers = #tpu.dot_dimension_numbers<[1], [0], [0], [1], [0, 0, 1, 1], [], []>} : vector<2x32xf32>, vector<32x32xf32>, vector<2x32xf32> -> vector<2x32xf32>
    %cst_33 = arith.constant dense<0.000000e+00> : vector<2x32xf32>
    %32 = tpu.matmul %29, %27, %cst_33 {dimension_numbers = #tpu.dot_dimension_numbers<[1], [0], [0], [1], [0, 0, 1, 1], [], []>} : vector<2x32xf32>, vector<32x32xf32>, vector<2x32xf32> -> vector<2x32xf32>
    %33 = vector.broadcast %28 : vector<1x32xf32> to vector<2x32xf32>
    %34 = arith.addf %32, %33 : vector<2x32xf32>
    %35 = vector.extract_strided_slice %7 {offsets = [0, 0], sizes = [2, 32], strides = [1, 1]} : vector<16x32xf32> to vector<2x32xf32>
    %36 = arith.addf %35, %30 : vector<2x32xf32>
    %37 = arith.negf %36 : vector<2x32xf32>
    %38 = math.exp %37 : vector<2x32xf32>
    %cst_34 = arith.constant 1.000000e+00 : f32
    %39 = vector.broadcast %cst_34 : f32 to vector<2x32xf32>
    %40 = arith.addf %39, %38 : vector<2x32xf32>
    %41 = arith.divf %39, %40 : vector<2x32xf32>
    %42 = vector.extract_strided_slice %14 {offsets = [0, 0], sizes = [2, 32], strides = [1, 1]} : vector<16x32xf32> to vector<2x32xf32>
    %43 = arith.addf %42, %31 : vector<2x32xf32>
    %44 = arith.negf %43 : vector<2x32xf32>
    %45 = math.exp %44 : vector<2x32xf32>
    %cst_35 = arith.constant 1.000000e+00 : f32
    %46 = vector.broadcast %cst_35 : f32 to vector<2x32xf32>
    %47 = arith.addf %46, %45 : vector<2x32xf32>
    %48 = arith.divf %46, %47 : vector<2x32xf32>
    %49 = vector.extract_strided_slice %21 {offsets = [0, 0], sizes = [2, 32], strides = [1, 1]} : vector<16x32xf32> to vector<2x32xf32>
    %50 = arith.mulf %41, %34 : vector<2x32xf32>
    %51 = arith.addf %49, %50 : vector<2x32xf32>
    %52 = math.tanh %51 : vector<2x32xf32>
    %cst_36 = arith.constant 1.000000e+00 : f32
    %53 = vector.broadcast %cst_36 : f32 to vector<2x32xf32>
    %54 = arith.subf %53, %48 : vector<2x32xf32>
    %55 = arith.mulf %54, %52 : vector<2x32xf32>
    %56 = arith.mulf %48, %29 : vector<2x32xf32>
    %57 = arith.addf %55, %56 : vector<2x32xf32>
    %c0_37 = arith.constant 0 : index
    %c0_38 = arith.constant 0 : index
    %58 = vector.load %arg12[%c0_37, %c0_38] : memref<16x32xf32, #tpu.memory_space<vmem>>, vector<2x32xf32>
    tpu.vector_store %arg12[%c0_37, %c0_38], %57 {strides = array<i32>} : memref<16x32xf32, #tpu.memory_space<vmem>>, vector<2x32xf32>,
    %cst_39 = arith.constant dense<0.000000e+00> : vector<2x32xf32>
    %59 = tpu.matmul %57, %23, %cst_39 {dimension_numbers = #tpu.dot_dimension_numbers<[1], [0], [0], [1], [0, 0, 1, 1], [], []>} : vector<2x32xf32>, vector<32x32xf32>, vector<2x32xf32> -> vector<2x32xf32>
    %cst_40 = arith.constant dense<0.000000e+00> : vector<2x32xf32>
    %60 = tpu.matmul %57, %25, %cst_40 {dimension_numbers = #tpu.dot_dimension_numbers<[1], [0], [0], [1], [0, 0, 1, 1], [], []>} : vector<2x32xf32>, vector<32x32xf32>, vector<2x32xf32> -> vector<2x32xf32>
    %cst_41 = arith.constant dense<0.000000e+00> : vector<2x32xf32>
    %61 = tpu.matmul %57, %27, %cst_41 {dimension_numbers = #tpu.dot_dimension_numbers<[1], [0], [0], [1], [0, 0, 1, 1], [], []>} : vector<2x32xf32>, vector<32x32xf32>, vector<2x32xf32> -> vector<2x32xf32>
    %62 = vector.broadcast %28 : vector<1x32xf32> to vector<2x32xf32>
    %63 = arith.addf %61, %62 : vector<2x32xf32>
    %64 = vector.extract_strided_slice %7 {offsets = [2, 0], sizes = [2, 32], strides = [1, 1]} : vector<16x32xf32> to vector<2x32xf32>
    %65 = arith.addf %64, %59 : vector<2x32xf32>
    %66 = arith.negf %65 : vector<2x32xf32>
    %67 = math.exp %66 : vector<2x32xf32>
    %cst_42 = arith.constant 1.000000e+00 : f32
    %68 = vector.broadcast %cst_42 : f32 to vector<2x32xf32>
    %69 = arith.addf %68, %67 : vector<2x32xf32>
    %70 = arith.divf %68, %69 : vector<2x32xf32>
    %71 = vector.extract_strided_slice %14 {offsets = [2, 0], sizes = [2, 32], strides = [1, 1]} : vector<16x32xf32> to vector<2x32xf32>
    %72 = arith.addf %71, %60 : vector<2x32xf32>
    %73 = arith.negf %72 : vector<2x32xf32>
    %74 = math.exp %73 : vector<2x32xf32>
    %cst_43 = arith.constant 1.000000e+00 : f32
    %75 = vector.broadcast %cst_43 : f32 to vector<2x32xf32>
    %76 = arith.addf %75, %74 : vector<2x32xf32>
    %77 = arith.divf %75, %76 : vector<2x32xf32>
    %78 = vector.extract_strided_slice %21 {offsets = [2, 0], sizes = [2, 32], strides = [1, 1]} : vector<16x32xf32> to vector<2x32xf32>
    %79 = arith.mulf %70, %63 : vector<2x32xf32>
    %80 = arith.addf %78, %79 : vector<2x32xf32>
    %81 = math.tanh %80 : vector<2x32xf32>
    %cst_44 = arith.constant 1.000000e+00 : f32
    %82 = vector.broadcast %cst_44 : f32 to vector<2x32xf32>
    %83 = arith.subf %82, %77 : vector<2x32xf32>
    %84 = arith.mulf %83, %81 : vector<2x32xf32>
    %85 = arith.mulf %77, %57 : vector<2x32xf32>
    %86 = arith.addf %84, %85 : vector<2x32xf32>
    %c2_45 = arith.constant 2 : index
    %c0_46 = arith.constant 0 : index
    %87 = vector.load %arg12[%c2_45, %c0_46] : memref<16x32xf32, #tpu.memory_space<vmem>>, vector<2x32xf32>
    tpu.vector_store %arg12[%c2_45, %c0_46], %86 {strides = array<i32>} : memref<16x32xf32, #tpu.memory_space<vmem>>, vector<2x32xf32>,
    %cst_47 = arith.constant dense<0.000000e+00> : vector<2x32xf32>
    %88 = tpu.matmul %86, %23, %cst_47 {dimension_numbers = #tpu.dot_dimension_numbers<[1], [0], [0], [1], [0, 0, 1, 1], [], []>} : vector<2x32xf32>, vector<32x32xf32>, vector<2x32xf32> -> vector<2x32xf32>
    %cst_48 = arith.constant dense<0.000000e+00> : vector<2x32xf32>
    %89 = tpu.matmul %86, %25, %cst_48 {dimension_numbers = #tpu.dot_dimension_numbers<[1], [0], [0], [1], [0, 0, 1, 1], [], []>} : vector<2x32xf32>, vector<32x32xf32>, vector<2x32xf32> -> vector<2x32xf32>
    %cst_49 = arith.constant dense<0.000000e+00> : vector<2x32xf32>
    %90 = tpu.matmul %86, %27, %cst_49 {dimension_numbers = #tpu.dot_dimension_numbers<[1], [0], [0], [1], [0, 0, 1, 1], [], []>} : vector<2x32xf32>, vector<32x32xf32>, vector<2x32xf32> -> vector<2x32xf32>
    %91 = vector.broadcast %28 : vector<1x32xf32> to vector<2x32xf32>
    %92 = arith.addf %90, %91 : vector<2x32xf32>
    %93 = vector.extract_strided_slice %7 {offsets = [4, 0], sizes = [2, 32], strides = [1, 1]} : vector<16x32xf32> to vector<2x32xf32>
    %94 = arith.addf %93, %88 : vector<2x32xf32>
    %95 = arith.negf %94 : vector<2x32xf32>
    %96 = math.exp %95 : vector<2x32xf32>
    %cst_50 = arith.constant 1.000000e+00 : f32
    %97 = vector.broadcast %cst_50 : f32 to vector<2x32xf32>
    %98 = arith.addf %97, %96 : vector<2x32xf32>
    %99 = arith.divf %97, %98 : vector<2x32xf32>
    %100 = vector.extract_strided_slice %14 {offsets = [4, 0], sizes = [2, 32], strides = [1, 1]} : vector<16x32xf32> to vector<2x32xf32>
    %101 = arith.addf %100, %89 : vector<2x32xf32>
    %102 = arith.negf %101 : vector<2x32xf32>
    %103 = math.exp %102 : vector<2x32xf32>
    %cst_51 = arith.constant 1.000000e+00 : f32
    %104 = vector.broadcast %cst_51 : f32 to vector<2x32xf32>
    %105 = arith.addf %104, %103 : vector<2x32xf32>
    %106 = arith.divf %104, %105 : vector<2x32xf32>
    %107 = vector.extract_strided_slice %21 {offsets = [4, 0], sizes = [2, 32], strides = [1, 1]} : vector<16x32xf32> to vector<2x32xf32>
    %108 = arith.mulf %99, %92 : vector<2x32xf32>
    %109 = arith.addf %107, %108 : vector<2x32xf32>
    %110 = math.tanh %109 : vector<2x32xf32>
    %cst_52 = arith.constant 1.000000e+00 : f32
    %111 = vector.broadcast %cst_52 : f32 to vector<2x32xf32>
    %112 = arith.subf %111, %106 : vector<2x32xf32>
    %113 = arith.mulf %112, %110 : vector<2x32xf32>
    %114 = arith.mulf %106, %86 : vector<2x32xf32>
    %115 = arith.addf %113, %114 : vector<2x32xf32>
    %c4 = arith.constant 4 : index
    %c0_53 = arith.constant 0 : index
    %116 = vector.load %arg12[%c4, %c0_53] : memref<16x32xf32, #tpu.memory_space<vmem>>, vector<2x32xf32>
    tpu.vector_store %arg12[%c4, %c0_53], %115 {strides = array<i32>} : memref<16x32xf32, #tpu.memory_space<vmem>>, vector<2x32xf32>,
    %cst_54 = arith.constant dense<0.000000e+00> : vector<2x32xf32>
    %117 = tpu.matmul %115, %23, %cst_54 {dimension_numbers = #tpu.dot_dimension_numbers<[1], [0], [0], [1], [0, 0, 1, 1], [], []>} : vector<2x32xf32>, vector<32x32xf32>, vector<2x32xf32> -> vector<2x32xf32>
    %cst_55 = arith.constant dense<0.000000e+00> : vector<2x32xf32>
    %118 = tpu.matmul %115, %25, %cst_55 {dimension_numbers = #tpu.dot_dimension_numbers<[1], [0], [0], [1], [0, 0, 1, 1], [], []>} : vector<2x32xf32>, vector<32x32xf32>, vector<2x32xf32> -> vector<2x32xf32>
    %cst_56 = arith.constant dense<0.000000e+00> : vector<2x32xf32>
    %119 = tpu.matmul %115, %27, %cst_56 {dimension_numbers = #tpu.dot_dimension_numbers<[1], [0], [0], [1], [0, 0, 1, 1], [], []>} : vector<2x32xf32>, vector<32x32xf32>, vector<2x32xf32> -> vector<2x32xf32>
    %120 = vector.broadcast %28 : vector<1x32xf32> to vector<2x32xf32>
    %121 = arith.addf %119, %120 : vector<2x32xf32>
    %122 = vector.extract_strided_slice %7 {offsets = [6, 0], sizes = [2, 32], strides = [1, 1]} : vector<16x32xf32> to vector<2x32xf32>
    %123 = arith.addf %122, %117 : vector<2x32xf32>
    %124 = arith.negf %123 : vector<2x32xf32>
    %125 = math.exp %124 : vector<2x32xf32>
    %cst_57 = arith.constant 1.000000e+00 : f32
    %126 = vector.broadcast %cst_57 : f32 to vector<2x32xf32>
    %127 = arith.addf %126, %125 : vector<2x32xf32>
    %128 = arith.divf %126, %127 : vector<2x32xf32>
    %129 = vector.extract_strided_slice %14 {offsets = [6, 0], sizes = [2, 32], strides = [1, 1]} : vector<16x32xf32> to vector<2x32xf32>
    %130 = arith.addf %129, %118 : vector<2x32xf32>
    %131 = arith.negf %130 : vector<2x32xf32>
    %132 = math.exp %131 : vector<2x32xf32>
    %cst_58 = arith.constant 1.000000e+00 : f32
    %133 = vector.broadcast %cst_58 : f32 to vector<2x32xf32>
    %134 = arith.addf %133, %132 : vector<2x32xf32>
    %135 = arith.divf %133, %134 : vector<2x32xf32>
    %136 = vector.extract_strided_slice %21 {offsets = [6, 0], sizes = [2, 32], strides = [1, 1]} : vector<16x32xf32> to vector<2x32xf32>
    %137 = arith.mulf %128, %121 : vector<2x32xf32>
    %138 = arith.addf %136, %137 : vector<2x32xf32>
    %139 = math.tanh %138 : vector<2x32xf32>
    %cst_59 = arith.constant 1.000000e+00 : f32
    %140 = vector.broadcast %cst_59 : f32 to vector<2x32xf32>
    %141 = arith.subf %140, %135 : vector<2x32xf32>
    %142 = arith.mulf %141, %139 : vector<2x32xf32>
    %143 = arith.mulf %135, %115 : vector<2x32xf32>
    %144 = arith.addf %142, %143 : vector<2x32xf32>
    %c6 = arith.constant 6 : index
    %c0_60 = arith.constant 0 : index
    %145 = vector.load %arg12[%c6, %c0_60] : memref<16x32xf32, #tpu.memory_space<vmem>>, vector<2x32xf32>
    tpu.vector_store %arg12[%c6, %c0_60], %144 {strides = array<i32>} : memref<16x32xf32, #tpu.memory_space<vmem>>, vector<2x32xf32>,
    %cst_61 = arith.constant dense<0.000000e+00> : vector<2x32xf32>
    %146 = tpu.matmul %144, %23, %cst_61 {dimension_numbers = #tpu.dot_dimension_numbers<[1], [0], [0], [1], [0, 0, 1, 1], [], []>} : vector<2x32xf32>, vector<32x32xf32>, vector<2x32xf32> -> vector<2x32xf32>
    %cst_62 = arith.constant dense<0.000000e+00> : vector<2x32xf32>
    %147 = tpu.matmul %144, %25, %cst_62 {dimension_numbers = #tpu.dot_dimension_numbers<[1], [0], [0], [1], [0, 0, 1, 1], [], []>} : vector<2x32xf32>, vector<32x32xf32>, vector<2x32xf32> -> vector<2x32xf32>
    %cst_63 = arith.constant dense<0.000000e+00> : vector<2x32xf32>
    %148 = tpu.matmul %144, %27, %cst_63 {dimension_numbers = #tpu.dot_dimension_numbers<[1], [0], [0], [1], [0, 0, 1, 1], [], []>} : vector<2x32xf32>, vector<32x32xf32>, vector<2x32xf32> -> vector<2x32xf32>
    %149 = vector.broadcast %28 : vector<1x32xf32> to vector<2x32xf32>
    %150 = arith.addf %148, %149 : vector<2x32xf32>
    %151 = vector.extract_strided_slice %7 {offsets = [8, 0], sizes = [2, 32], strides = [1, 1]} : vector<16x32xf32> to vector<2x32xf32>
    %152 = arith.addf %151, %146 : vector<2x32xf32>
    %153 = arith.negf %152 : vector<2x32xf32>
    %154 = math.exp %153 : vector<2x32xf32>
    %cst_64 = arith.constant 1.000000e+00 : f32
    %155 = vector.broadcast %cst_64 : f32 to vector<2x32xf32>
    %156 = arith.addf %155, %154 : vector<2x32xf32>
    %157 = arith.divf %155, %156 : vector<2x32xf32>
    %158 = vector.extract_strided_slice %14 {offsets = [8, 0], sizes = [2, 32], strides = [1, 1]} : vector<16x32xf32> to vector<2x32xf32>
    %159 = arith.addf %158, %147 : vector<2x32xf32>
    %160 = arith.negf %159 : vector<2x32xf32>
    %161 = math.exp %160 : vector<2x32xf32>
    %cst_65 = arith.constant 1.000000e+00 : f32
    %162 = vector.broadcast %cst_65 : f32 to vector<2x32xf32>
    %163 = arith.addf %162, %161 : vector<2x32xf32>
    %164 = arith.divf %162, %163 : vector<2x32xf32>
    %165 = vector.extract_strided_slice %21 {offsets = [8, 0], sizes = [2, 32], strides = [1, 1]} : vector<16x32xf32> to vector<2x32xf32>
    %166 = arith.mulf %157, %150 : vector<2x32xf32>
    %167 = arith.addf %165, %166 : vector<2x32xf32>
    %168 = math.tanh %167 : vector<2x32xf32>
    %cst_66 = arith.constant 1.000000e+00 : f32
    %169 = vector.broadcast %cst_66 : f32 to vector<2x32xf32>
    %170 = arith.subf %169, %164 : vector<2x32xf32>
    %171 = arith.mulf %170, %168 : vector<2x32xf32>
    %172 = arith.mulf %164, %144 : vector<2x32xf32>
    %173 = arith.addf %171, %172 : vector<2x32xf32>
    %c8 = arith.constant 8 : index
    %c0_67 = arith.constant 0 : index
    %174 = vector.load %arg12[%c8, %c0_67] : memref<16x32xf32, #tpu.memory_space<vmem>>, vector<2x32xf32>
    tpu.vector_store %arg12[%c8, %c0_67], %173 {strides = array<i32>} : memref<16x32xf32, #tpu.memory_space<vmem>>, vector<2x32xf32>,
    %cst_68 = arith.constant dense<0.000000e+00> : vector<2x32xf32>
    %175 = tpu.matmul %173, %23, %cst_68 {dimension_numbers = #tpu.dot_dimension_numbers<[1], [0], [0], [1], [0, 0, 1, 1], [], []>} : vector<2x32xf32>, vector<32x32xf32>, vector<2x32xf32> -> vector<2x32xf32>
    %cst_69 = arith.constant dense<0.000000e+00> : vector<2x32xf32>
    %176 = tpu.matmul %173, %25, %cst_69 {dimension_numbers = #tpu.dot_dimension_numbers<[1], [0], [0], [1], [0, 0, 1, 1], [], []>} : vector<2x32xf32>, vector<32x32xf32>, vector<2x32xf32> -> vector<2x32xf32>
    %cst_70 = arith.constant dense<0.000000e+00> : vector<2x32xf32>
    %177 = tpu.matmul %173, %27, %cst_70 {dimension_numbers = #tpu.dot_dimension_numbers<[1], [0], [0], [1], [0, 0, 1, 1], [], []>} : vector<2x32xf32>, vector<32x32xf32>, vector<2x32xf32> -> vector<2x32xf32>
    %178 = vector.broadcast %28 : vector<1x32xf32> to vector<2x32xf32>
    %179 = arith.addf %177, %178 : vector<2x32xf32>
    %180 = vector.extract_strided_slice %7 {offsets = [10, 0], sizes = [2, 32], strides = [1, 1]} : vector<16x32xf32> to vector<2x32xf32>
    %181 = arith.addf %180, %175 : vector<2x32xf32>
    %182 = arith.negf %181 : vector<2x32xf32>
    %183 = math.exp %182 : vector<2x32xf32>
    %cst_71 = arith.constant 1.000000e+00 : f32
    %184 = vector.broadcast %cst_71 : f32 to vector<2x32xf32>
    %185 = arith.addf %184, %183 : vector<2x32xf32>
    %186 = arith.divf %184, %185 : vector<2x32xf32>
    %187 = vector.extract_strided_slice %14 {offsets = [10, 0], sizes = [2, 32], strides = [1, 1]} : vector<16x32xf32> to vector<2x32xf32>
    %188 = arith.addf %187, %176 : vector<2x32xf32>
    %189 = arith.negf %188 : vector<2x32xf32>
    %190 = math.exp %189 : vector<2x32xf32>
    %cst_72 = arith.constant 1.000000e+00 : f32
    %191 = vector.broadcast %cst_72 : f32 to vector<2x32xf32>
    %192 = arith.addf %191, %190 : vector<2x32xf32>
    %193 = arith.divf %191, %192 : vector<2x32xf32>
    %194 = vector.extract_strided_slice %21 {offsets = [10, 0], sizes = [2, 32], strides = [1, 1]} : vector<16x32xf32> to vector<2x32xf32>
    %195 = arith.mulf %186, %179 : vector<2x32xf32>
    %196 = arith.addf %194, %195 : vector<2x32xf32>
    %197 = math.tanh %196 : vector<2x32xf32>
    %cst_73 = arith.constant 1.000000e+00 : f32
    %198 = vector.broadcast %cst_73 : f32 to vector<2x32xf32>
    %199 = arith.subf %198, %193 : vector<2x32xf32>
    %200 = arith.mulf %199, %197 : vector<2x32xf32>
    %201 = arith.mulf %193, %173 : vector<2x32xf32>
    %202 = arith.addf %200, %201 : vector<2x32xf32>
    %c10 = arith.constant 10 : index
    %c0_74 = arith.constant 0 : index
    %203 = vector.load %arg12[%c10, %c0_74] : memref<16x32xf32, #tpu.memory_space<vmem>>, vector<2x32xf32>
    tpu.vector_store %arg12[%c10, %c0_74], %202 {strides = array<i32>} : memref<16x32xf32, #tpu.memory_space<vmem>>, vector<2x32xf32>,
    %cst_75 = arith.constant dense<0.000000e+00> : vector<2x32xf32>
    %204 = tpu.matmul %202, %23, %cst_75 {dimension_numbers = #tpu.dot_dimension_numbers<[1], [0], [0], [1], [0, 0, 1, 1], [], []>} : vector<2x32xf32>, vector<32x32xf32>, vector<2x32xf32> -> vector<2x32xf32>
    %cst_76 = arith.constant dense<0.000000e+00> : vector<2x32xf32>
    %205 = tpu.matmul %202, %25, %cst_76 {dimension_numbers = #tpu.dot_dimension_numbers<[1], [0], [0], [1], [0, 0, 1, 1], [], []>} : vector<2x32xf32>, vector<32x32xf32>, vector<2x32xf32> -> vector<2x32xf32>
    %cst_77 = arith.constant dense<0.000000e+00> : vector<2x32xf32>
    %206 = tpu.matmul %202, %27, %cst_77 {dimension_numbers = #tpu.dot_dimension_numbers<[1], [0], [0], [1], [0, 0, 1, 1], [], []>} : vector<2x32xf32>, vector<32x32xf32>, vector<2x32xf32> -> vector<2x32xf32>
    %207 = vector.broadcast %28 : vector<1x32xf32> to vector<2x32xf32>
    %208 = arith.addf %206, %207 : vector<2x32xf32>
    %209 = vector.extract_strided_slice %7 {offsets = [12, 0], sizes = [2, 32], strides = [1, 1]} : vector<16x32xf32> to vector<2x32xf32>
    %210 = arith.addf %209, %204 : vector<2x32xf32>
    %211 = arith.negf %210 : vector<2x32xf32>
    %212 = math.exp %211 : vector<2x32xf32>
    %cst_78 = arith.constant 1.000000e+00 : f32
    %213 = vector.broadcast %cst_78 : f32 to vector<2x32xf32>
    %214 = arith.addf %213, %212 : vector<2x32xf32>
    %215 = arith.divf %213, %214 : vector<2x32xf32>
    %216 = vector.extract_strided_slice %14 {offsets = [12, 0], sizes = [2, 32], strides = [1, 1]} : vector<16x32xf32> to vector<2x32xf32>
    %217 = arith.addf %216, %205 : vector<2x32xf32>
    %218 = arith.negf %217 : vector<2x32xf32>
    %219 = math.exp %218 : vector<2x32xf32>
    %cst_79 = arith.constant 1.000000e+00 : f32
    %220 = vector.broadcast %cst_79 : f32 to vector<2x32xf32>
    %221 = arith.addf %220, %219 : vector<2x32xf32>
    %222 = arith.divf %220, %221 : vector<2x32xf32>
    %223 = vector.extract_strided_slice %21 {offsets = [12, 0], sizes = [2, 32], strides = [1, 1]} : vector<16x32xf32> to vector<2x32xf32>
    %224 = arith.mulf %215, %208 : vector<2x32xf32>
    %225 = arith.addf %223, %224 : vector<2x32xf32>
    %226 = math.tanh %225 : vector<2x32xf32>
    %cst_80 = arith.constant 1.000000e+00 : f32
    %227 = vector.broadcast %cst_80 : f32 to vector<2x32xf32>
    %228 = arith.subf %227, %222 : vector<2x32xf32>
    %229 = arith.mulf %228, %226 : vector<2x32xf32>
    %230 = arith.mulf %222, %202 : vector<2x32xf32>
    %231 = arith.addf %229, %230 : vector<2x32xf32>
    %c12 = arith.constant 12 : index
    %c0_81 = arith.constant 0 : index
    %232 = vector.load %arg12[%c12, %c0_81] : memref<16x32xf32, #tpu.memory_space<vmem>>, vector<2x32xf32>
    tpu.vector_store %arg12[%c12, %c0_81], %231 {strides = array<i32>} : memref<16x32xf32, #tpu.memory_space<vmem>>, vector<2x32xf32>,
    %cst_82 = arith.constant dense<0.000000e+00> : vector<2x32xf32>
    %233 = tpu.matmul %231, %23, %cst_82 {dimension_numbers = #tpu.dot_dimension_numbers<[1], [0], [0], [1], [0, 0, 1, 1], [], []>} : vector<2x32xf32>, vector<32x32xf32>, vector<2x32xf32> -> vector<2x32xf32>
    %cst_83 = arith.constant dense<0.000000e+00> : vector<2x32xf32>
    %234 = tpu.matmul %231, %25, %cst_83 {dimension_numbers = #tpu.dot_dimension_numbers<[1], [0], [0], [1], [0, 0, 1, 1], [], []>} : vector<2x32xf32>, vector<32x32xf32>, vector<2x32xf32> -> vector<2x32xf32>
    %cst_84 = arith.constant dense<0.000000e+00> : vector<2x32xf32>
    %235 = tpu.matmul %231, %27, %cst_84 {dimension_numbers = #tpu.dot_dimension_numbers<[1], [0], [0], [1], [0, 0, 1, 1], [], []>} : vector<2x32xf32>, vector<32x32xf32>, vector<2x32xf32> -> vector<2x32xf32>
    %236 = vector.broadcast %28 : vector<1x32xf32> to vector<2x32xf32>
    %237 = arith.addf %235, %236 : vector<2x32xf32>
    %238 = vector.extract_strided_slice %7 {offsets = [14, 0], sizes = [2, 32], strides = [1, 1]} : vector<16x32xf32> to vector<2x32xf32>
    %239 = arith.addf %238, %233 : vector<2x32xf32>
    %240 = arith.negf %239 : vector<2x32xf32>
    %241 = math.exp %240 : vector<2x32xf32>
    %cst_85 = arith.constant 1.000000e+00 : f32
    %242 = vector.broadcast %cst_85 : f32 to vector<2x32xf32>
    %243 = arith.addf %242, %241 : vector<2x32xf32>
    %244 = arith.divf %242, %243 : vector<2x32xf32>
    %245 = vector.extract_strided_slice %14 {offsets = [14, 0], sizes = [2, 32], strides = [1, 1]} : vector<16x32xf32> to vector<2x32xf32>
    %246 = arith.addf %245, %234 : vector<2x32xf32>
    %247 = arith.negf %246 : vector<2x32xf32>
    %248 = math.exp %247 : vector<2x32xf32>
    %cst_86 = arith.constant 1.000000e+00 : f32
    %249 = vector.broadcast %cst_86 : f32 to vector<2x32xf32>
    %250 = arith.addf %249, %248 : vector<2x32xf32>
    %251 = arith.divf %249, %250 : vector<2x32xf32>
    %252 = vector.extract_strided_slice %21 {offsets = [14, 0], sizes = [2, 32], strides = [1, 1]} : vector<16x32xf32> to vector<2x32xf32>
    %253 = arith.mulf %244, %237 : vector<2x32xf32>
    %254 = arith.addf %252, %253 : vector<2x32xf32>
    %255 = math.tanh %254 : vector<2x32xf32>
    %cst_87 = arith.constant 1.000000e+00 : f32
    %256 = vector.broadcast %cst_87 : f32 to vector<2x32xf32>
    %257 = arith.subf %256, %251 : vector<2x32xf32>
    %258 = arith.mulf %257, %255 : vector<2x32xf32>
    %259 = arith.mulf %251, %231 : vector<2x32xf32>
    %260 = arith.addf %258, %259 : vector<2x32xf32>
    %c14 = arith.constant 14 : index
    %c0_88 = arith.constant 0 : index
    %261 = vector.load %arg12[%c14, %c0_88] : memref<16x32xf32, #tpu.memory_space<vmem>>, vector<2x32xf32>
    tpu.vector_store %arg12[%c14, %c0_88], %260 {strides = array<i32>} : memref<16x32xf32, #tpu.memory_space<vmem>>, vector<2x32xf32>,
    %c0_89 = arith.constant 0 : index
    %c0_90 = arith.constant 0 : index
    %262 = vector.load %arg12[%c0_89, %c0_90] : memref<16x32xf32, #tpu.memory_space<vmem>>, vector<16x32xf32>
    %c0_91 = arith.constant 0 : index
    %c0_92 = arith.constant 0 : index
    %c0_93 = arith.constant 0 : index
    %263 = vector.load %arg5[%c0_91, %c0_92, %c0_93] : memref<3x32x32xf32, #tpu.memory_space<vmem>>, vector<1x32x32xf32>
    %264 = vector.shape_cast %263 : vector<1x32x32xf32> to vector<32x32xf32>
    %cst_94 = arith.constant dense<0.000000e+00> : vector<16x32xf32>
    %265 = tpu.matmul %262, %264, %cst_94 {dimension_numbers = #tpu.dot_dimension_numbers<[1], [0], [0], [1], [0, 0, 1, 1], [], []>} : vector<16x32xf32>, vector<32x32xf32>, vector<16x32xf32> -> vector<16x32xf32>
    %c0_95 = arith.constant 0 : index
    %c0_96 = arith.constant 0 : index
    %c0_97 = arith.constant 0 : index
    %266 = vector.load %arg7[%c0_95, %c0_96, %c0_97] : memref<3x1x32xf32, #tpu.memory_space<vmem>>, vector<1x1x32xf32>
    %267 = vector.shape_cast %266 : vector<1x1x32xf32> to vector<1x32xf32>
    %268 = vector.broadcast %267 : vector<1x32xf32> to vector<16x32xf32>
    %269 = arith.addf %265, %268 : vector<16x32xf32>
    %c1_98 = arith.constant 1 : index
    %c0_99 = arith.constant 0 : index
    %c0_100 = arith.constant 0 : index
    %270 = vector.load %arg5[%c1_98, %c0_99, %c0_100] : memref<3x32x32xf32, #tpu.memory_space<vmem>>, vector<1x32x32xf32>
    %271 = vector.shape_cast %270 : vector<1x32x32xf32> to vector<32x32xf32>
    %cst_101 = arith.constant dense<0.000000e+00> : vector<16x32xf32>
    %272 = tpu.matmul %262, %271, %cst_101 {dimension_numbers = #tpu.dot_dimension_numbers<[1], [0], [0], [1], [0, 0, 1, 1], [], []>} : vector<16x32xf32>, vector<32x32xf32>, vector<16x32xf32> -> vector<16x32xf32>
    %c1_102 = arith.constant 1 : index
    %c0_103 = arith.constant 0 : index
    %c0_104 = arith.constant 0 : index
    %273 = vector.load %arg7[%c1_102, %c0_103, %c0_104] : memref<3x1x32xf32, #tpu.memory_space<vmem>>, vector<1x1x32xf32>
    %274 = vector.shape_cast %273 : vector<1x1x32xf32> to vector<1x32xf32>
    %275 = vector.broadcast %274 : vector<1x32xf32> to vector<16x32xf32>
    %276 = arith.addf %272, %275 : vector<16x32xf32>
    %c2_105 = arith.constant 2 : index
    %c0_106 = arith.constant 0 : index
    %c0_107 = arith.constant 0 : index
    %277 = vector.load %arg5[%c2_105, %c0_106, %c0_107] : memref<3x32x32xf32, #tpu.memory_space<vmem>>, vector<1x32x32xf32>
    %278 = vector.shape_cast %277 : vector<1x32x32xf32> to vector<32x32xf32>
    %cst_108 = arith.constant dense<0.000000e+00> : vector<16x32xf32>
    %279 = tpu.matmul %262, %278, %cst_108 {dimension_numbers = #tpu.dot_dimension_numbers<[1], [0], [0], [1], [0, 0, 1, 1], [], []>} : vector<16x32xf32>, vector<32x32xf32>, vector<16x32xf32> -> vector<16x32xf32>
    %c2_109 = arith.constant 2 : index
    %c0_110 = arith.constant 0 : index
    %c0_111 = arith.constant 0 : index
    %280 = vector.load %arg7[%c2_109, %c0_110, %c0_111] : memref<3x1x32xf32, #tpu.memory_space<vmem>>, vector<1x1x32xf32>
    %281 = vector.shape_cast %280 : vector<1x1x32xf32> to vector<1x32xf32>
    %282 = vector.broadcast %281 : vector<1x32xf32> to vector<16x32xf32>
    %283 = arith.addf %279, %282 : vector<16x32xf32>
    %c0_112 = arith.constant 0 : index
    %c0_113 = arith.constant 0 : index
    %c0_114 = arith.constant 0 : index
    %284 = vector.load %arg6[%c0_112, %c0_113, %c0_114] : memref<3x32x32xf32, #tpu.memory_space<vmem>>, vector<1x32x32xf32>
    %285 = vector.shape_cast %284 : vector<1x32x32xf32> to vector<32x32xf32>
    %c1_115 = arith.constant 1 : index
    %c0_116 = arith.constant 0 : index
    %c0_117 = arith.constant 0 : index
    %286 = vector.load %arg6[%c1_115, %c0_116, %c0_117] : memref<3x32x32xf32, #tpu.memory_space<vmem>>, vector<1x32x32xf32>
    %287 = vector.shape_cast %286 : vector<1x32x32xf32> to vector<32x32xf32>
    %c2_118 = arith.constant 2 : index
    %c0_119 = arith.constant 0 : index
    %c0_120 = arith.constant 0 : index
    %288 = vector.load %arg6[%c2_118, %c0_119, %c0_120] : memref<3x32x32xf32, #tpu.memory_space<vmem>>, vector<1x32x32xf32>
    %289 = vector.shape_cast %288 : vector<1x32x32xf32> to vector<32x32xf32>
    %c0_121 = arith.constant 0 : index
    %c0_122 = arith.constant 0 : index
    %290 = vector.load %arg8[%c0_121, %c0_122] : memref<1x32xf32, #tpu.memory_space<vmem>>, vector<1x32xf32>
    %cst_123 = arith.constant 0.000000e+00 : f32
    %291 = vector.broadcast %cst_123 : f32 to vector<2x32xf32>
    %cst_124 = arith.constant dense<0.000000e+00> : vector<2x32xf32>
    %292 = tpu.matmul %291, %285, %cst_124 {dimension_numbers = #tpu.dot_dimension_numbers<[1], [0], [0], [1], [0, 0, 1, 1], [], []>} : vector<2x32xf32>, vector<32x32xf32>, vector<2x32xf32> -> vector<2x32xf32>
    %cst_125 = arith.constant dense<0.000000e+00> : vector<2x32xf32>
    %293 = tpu.matmul %291, %287, %cst_125 {dimension_numbers = #tpu.dot_dimension_numbers<[1], [0], [0], [1], [0, 0, 1, 1], [], []>} : vector<2x32xf32>, vector<32x32xf32>, vector<2x32xf32> -> vector<2x32xf32>
    %cst_126 = arith.constant dense<0.000000e+00> : vector<2x32xf32>
    %294 = tpu.matmul %291, %289, %cst_126 {dimension_numbers = #tpu.dot_dimension_numbers<[1], [0], [0], [1], [0, 0, 1, 1], [], []>} : vector<2x32xf32>, vector<32x32xf32>, vector<2x32xf32> -> vector<2x32xf32>
    %295 = vector.broadcast %290 : vector<1x32xf32> to vector<2x32xf32>
    %296 = arith.addf %294, %295 : vector<2x32xf32>
    %297 = vector.extract_strided_slice %269 {offsets = [0, 0], sizes = [2, 32], strides = [1, 1]} : vector<16x32xf32> to vector<2x32xf32>
    %298 = arith.addf %297, %292 : vector<2x32xf32>
    %299 = arith.negf %298 : vector<2x32xf32>
    %300 = math.exp %299 : vector<2x32xf32>
    %cst_127 = arith.constant 1.000000e+00 : f32
    %301 = vector.broadcast %cst_127 : f32 to vector<2x32xf32>
    %302 = arith.addf %301, %300 : vector<2x32xf32>
    %303 = arith.divf %301, %302 : vector<2x32xf32>
    %304 = vector.extract_strided_slice %276 {offsets = [0, 0], sizes = [2, 32], strides = [1, 1]} : vector<16x32xf32> to vector<2x32xf32>
    %305 = arith.addf %304, %293 : vector<2x32xf32>
    %306 = arith.negf %305 : vector<2x32xf32>
    %307 = math.exp %306 : vector<2x32xf32>
    %cst_128 = arith.constant 1.000000e+00 : f32
    %308 = vector.broadcast %cst_128 : f32 to vector<2x32xf32>
    %309 = arith.addf %308, %307 : vector<2x32xf32>
    %310 = arith.divf %308, %309 : vector<2x32xf32>
    %311 = vector.extract_strided_slice %283 {offsets = [0, 0], sizes = [2, 32], strides = [1, 1]} : vector<16x32xf32> to vector<2x32xf32>
    %312 = arith.mulf %303, %296 : vector<2x32xf32>
    %313 = arith.addf %311, %312 : vector<2x32xf32>
    %314 = math.tanh %313 : vector<2x32xf32>
    %cst_129 = arith.constant 1.000000e+00 : f32
    %315 = vector.broadcast %cst_129 : f32 to vector<2x32xf32>
    %316 = arith.subf %315, %310 : vector<2x32xf32>
    %317 = arith.mulf %316, %314 : vector<2x32xf32>
    %318 = arith.mulf %310, %291 : vector<2x32xf32>
    %319 = arith.addf %317, %318 : vector<2x32xf32>
    %cst_130 = arith.constant dense<0.000000e+00> : vector<2x32xf32>
    %320 = tpu.matmul %319, %285, %cst_130 {dimension_numbers = #tpu.dot_dimension_numbers<[1], [0], [0], [1], [0, 0, 1, 1], [], []>} : vector<2x32xf32>, vector<32x32xf32>, vector<2x32xf32> -> vector<2x32xf32>
    %cst_131 = arith.constant dense<0.000000e+00> : vector<2x32xf32>
    %321 = tpu.matmul %319, %287, %cst_131 {dimension_numbers = #tpu.dot_dimension_numbers<[1], [0], [0], [1], [0, 0, 1, 1], [], []>} : vector<2x32xf32>, vector<32x32xf32>, vector<2x32xf32> -> vector<2x32xf32>
    %cst_132 = arith.constant dense<0.000000e+00> : vector<2x32xf32>
    %322 = tpu.matmul %319, %289, %cst_132 {dimension_numbers = #tpu.dot_dimension_numbers<[1], [0], [0], [1], [0, 0, 1, 1], [], []>} : vector<2x32xf32>, vector<32x32xf32>, vector<2x32xf32> -> vector<2x32xf32>
    %323 = vector.broadcast %290 : vector<1x32xf32> to vector<2x32xf32>
    %324 = arith.addf %322, %323 : vector<2x32xf32>
    %325 = vector.extract_strided_slice %269 {offsets = [2, 0], sizes = [2, 32], strides = [1, 1]} : vector<16x32xf32> to vector<2x32xf32>
    %326 = arith.addf %325, %320 : vector<2x32xf32>
    %327 = arith.negf %326 : vector<2x32xf32>
    %328 = math.exp %327 : vector<2x32xf32>
    %cst_133 = arith.constant 1.000000e+00 : f32
    %329 = vector.broadcast %cst_133 : f32 to vector<2x32xf32>
    %330 = arith.addf %329, %328 : vector<2x32xf32>
    %331 = arith.divf %329, %330 : vector<2x32xf32>
    %332 = vector.extract_strided_slice %276 {offsets = [2, 0], sizes = [2, 32], strides = [1, 1]} : vector<16x32xf32> to vector<2x32xf32>
    %333 = arith.addf %332, %321 : vector<2x32xf32>
    %334 = arith.negf %333 : vector<2x32xf32>
    %335 = math.exp %334 : vector<2x32xf32>
    %cst_134 = arith.constant 1.000000e+00 : f32
    %336 = vector.broadcast %cst_134 : f32 to vector<2x32xf32>
    %337 = arith.addf %336, %335 : vector<2x32xf32>
    %338 = arith.divf %336, %337 : vector<2x32xf32>
    %339 = vector.extract_strided_slice %283 {offsets = [2, 0], sizes = [2, 32], strides = [1, 1]} : vector<16x32xf32> to vector<2x32xf32>
    %340 = arith.mulf %331, %324 : vector<2x32xf32>
    %341 = arith.addf %339, %340 : vector<2x32xf32>
    %342 = math.tanh %341 : vector<2x32xf32>
    %cst_135 = arith.constant 1.000000e+00 : f32
    %343 = vector.broadcast %cst_135 : f32 to vector<2x32xf32>
    %344 = arith.subf %343, %338 : vector<2x32xf32>
    %345 = arith.mulf %344, %342 : vector<2x32xf32>
    %346 = arith.mulf %338, %319 : vector<2x32xf32>
    %347 = arith.addf %345, %346 : vector<2x32xf32>
    %cst_136 = arith.constant dense<0.000000e+00> : vector<2x32xf32>
    %348 = tpu.matmul %347, %285, %cst_136 {dimension_numbers = #tpu.dot_dimension_numbers<[1], [0], [0], [1], [0, 0, 1, 1], [], []>} : vector<2x32xf32>, vector<32x32xf32>, vector<2x32xf32> -> vector<2x32xf32>
    %cst_137 = arith.constant dense<0.000000e+00> : vector<2x32xf32>
    %349 = tpu.matmul %347, %287, %cst_137 {dimension_numbers = #tpu.dot_dimension_numbers<[1], [0], [0], [1], [0, 0, 1, 1], [], []>} : vector<2x32xf32>, vector<32x32xf32>, vector<2x32xf32> -> vector<2x32xf32>
    %cst_138 = arith.constant dense<0.000000e+00> : vector<2x32xf32>
    %350 = tpu.matmul %347, %289, %cst_138 {dimension_numbers = #tpu.dot_dimension_numbers<[1], [0], [0], [1], [0, 0, 1, 1], [], []>} : vector<2x32xf32>, vector<32x32xf32>, vector<2x32xf32> -> vector<2x32xf32>
    %351 = vector.broadcast %290 : vector<1x32xf32> to vector<2x32xf32>
    %352 = arith.addf %350, %351 : vector<2x32xf32>
    %353 = vector.extract_strided_slice %269 {offsets = [4, 0], sizes = [2, 32], strides = [1, 1]} : vector<16x32xf32> to vector<2x32xf32>
    %354 = arith.addf %353, %348 : vector<2x32xf32>
    %355 = arith.negf %354 : vector<2x32xf32>
    %356 = math.exp %355 : vector<2x32xf32>
    %cst_139 = arith.constant 1.000000e+00 : f32
    %357 = vector.broadcast %cst_139 : f32 to vector<2x32xf32>
    %358 = arith.addf %357, %356 : vector<2x32xf32>
    %359 = arith.divf %357, %358 : vector<2x32xf32>
    %360 = vector.extract_strided_slice %276 {offsets = [4, 0], sizes = [2, 32], strides = [1, 1]} : vector<16x32xf32> to vector<2x32xf32>
    %361 = arith.addf %360, %349 : vector<2x32xf32>
    %362 = arith.negf %361 : vector<2x32xf32>
    %363 = math.exp %362 : vector<2x32xf32>
    %cst_140 = arith.constant 1.000000e+00 : f32
    %364 = vector.broadcast %cst_140 : f32 to vector<2x32xf32>
    %365 = arith.addf %364, %363 : vector<2x32xf32>
    %366 = arith.divf %364, %365 : vector<2x32xf32>
    %367 = vector.extract_strided_slice %283 {offsets = [4, 0], sizes = [2, 32], strides = [1, 1]} : vector<16x32xf32> to vector<2x32xf32>
    %368 = arith.mulf %359, %352 : vector<2x32xf32>
    %369 = arith.addf %367, %368 : vector<2x32xf32>
    %370 = math.tanh %369 : vector<2x32xf32>
    %cst_141 = arith.constant 1.000000e+00 : f32
    %371 = vector.broadcast %cst_141 : f32 to vector<2x32xf32>
    %372 = arith.subf %371, %366 : vector<2x32xf32>
    %373 = arith.mulf %372, %370 : vector<2x32xf32>
    %374 = arith.mulf %366, %347 : vector<2x32xf32>
    %375 = arith.addf %373, %374 : vector<2x32xf32>
    %cst_142 = arith.constant dense<0.000000e+00> : vector<2x32xf32>
    %376 = tpu.matmul %375, %285, %cst_142 {dimension_numbers = #tpu.dot_dimension_numbers<[1], [0], [0], [1], [0, 0, 1, 1], [], []>} : vector<2x32xf32>, vector<32x32xf32>, vector<2x32xf32> -> vector<2x32xf32>
    %cst_143 = arith.constant dense<0.000000e+00> : vector<2x32xf32>
    %377 = tpu.matmul %375, %287, %cst_143 {dimension_numbers = #tpu.dot_dimension_numbers<[1], [0], [0], [1], [0, 0, 1, 1], [], []>} : vector<2x32xf32>, vector<32x32xf32>, vector<2x32xf32> -> vector<2x32xf32>
    %cst_144 = arith.constant dense<0.000000e+00> : vector<2x32xf32>
    %378 = tpu.matmul %375, %289, %cst_144 {dimension_numbers = #tpu.dot_dimension_numbers<[1], [0], [0], [1], [0, 0, 1, 1], [], []>} : vector<2x32xf32>, vector<32x32xf32>, vector<2x32xf32> -> vector<2x32xf32>
    %379 = vector.broadcast %290 : vector<1x32xf32> to vector<2x32xf32>
    %380 = arith.addf %378, %379 : vector<2x32xf32>
    %381 = vector.extract_strided_slice %269 {offsets = [6, 0], sizes = [2, 32], strides = [1, 1]} : vector<16x32xf32> to vector<2x32xf32>
    %382 = arith.addf %381, %376 : vector<2x32xf32>
    %383 = arith.negf %382 : vector<2x32xf32>
    %384 = math.exp %383 : vector<2x32xf32>
    %cst_145 = arith.constant 1.000000e+00 : f32
    %385 = vector.broadcast %cst_145 : f32 to vector<2x32xf32>
    %386 = arith.addf %385, %384 : vector<2x32xf32>
    %387 = arith.divf %385, %386 : vector<2x32xf32>
    %388 = vector.extract_strided_slice %276 {offsets = [6, 0], sizes = [2, 32], strides = [1, 1]} : vector<16x32xf32> to vector<2x32xf32>
    %389 = arith.addf %388, %377 : vector<2x32xf32>
    %390 = arith.negf %389 : vector<2x32xf32>
    %391 = math.exp %390 : vector<2x32xf32>
    %cst_146 = arith.constant 1.000000e+00 : f32
    %392 = vector.broadcast %cst_146 : f32 to vector<2x32xf32>
    %393 = arith.addf %392, %391 : vector<2x32xf32>
    %394 = arith.divf %392, %393 : vector<2x32xf32>
    %395 = vector.extract_strided_slice %283 {offsets = [6, 0], sizes = [2, 32], strides = [1, 1]} : vector<16x32xf32> to vector<2x32xf32>
    %396 = arith.mulf %387, %380 : vector<2x32xf32>
    %397 = arith.addf %395, %396 : vector<2x32xf32>
    %398 = math.tanh %397 : vector<2x32xf32>
    %cst_147 = arith.constant 1.000000e+00 : f32
    %399 = vector.broadcast %cst_147 : f32 to vector<2x32xf32>
    %400 = arith.subf %399, %394 : vector<2x32xf32>
    %401 = arith.mulf %400, %398 : vector<2x32xf32>
    %402 = arith.mulf %394, %375 : vector<2x32xf32>
    %403 = arith.addf %401, %402 : vector<2x32xf32>
    %cst_148 = arith.constant dense<0.000000e+00> : vector<2x32xf32>
    %404 = tpu.matmul %403, %285, %cst_148 {dimension_numbers = #tpu.dot_dimension_numbers<[1], [0], [0], [1], [0, 0, 1, 1], [], []>} : vector<2x32xf32>, vector<32x32xf32>, vector<2x32xf32> -> vector<2x32xf32>
    %cst_149 = arith.constant dense<0.000000e+00> : vector<2x32xf32>
    %405 = tpu.matmul %403, %287, %cst_149 {dimension_numbers = #tpu.dot_dimension_numbers<[1], [0], [0], [1], [0, 0, 1, 1], [], []>} : vector<2x32xf32>, vector<32x32xf32>, vector<2x32xf32> -> vector<2x32xf32>
    %cst_150 = arith.constant dense<0.000000e+00> : vector<2x32xf32>
    %406 = tpu.matmul %403, %289, %cst_150 {dimension_numbers = #tpu.dot_dimension_numbers<[1], [0], [0], [1], [0, 0, 1, 1], [], []>} : vector<2x32xf32>, vector<32x32xf32>, vector<2x32xf32> -> vector<2x32xf32>
    %407 = vector.broadcast %290 : vector<1x32xf32> to vector<2x32xf32>
    %408 = arith.addf %406, %407 : vector<2x32xf32>
    %409 = vector.extract_strided_slice %269 {offsets = [8, 0], sizes = [2, 32], strides = [1, 1]} : vector<16x32xf32> to vector<2x32xf32>
    %410 = arith.addf %409, %404 : vector<2x32xf32>
    %411 = arith.negf %410 : vector<2x32xf32>
    %412 = math.exp %411 : vector<2x32xf32>
    %cst_151 = arith.constant 1.000000e+00 : f32
    %413 = vector.broadcast %cst_151 : f32 to vector<2x32xf32>
    %414 = arith.addf %413, %412 : vector<2x32xf32>
    %415 = arith.divf %413, %414 : vector<2x32xf32>
    %416 = vector.extract_strided_slice %276 {offsets = [8, 0], sizes = [2, 32], strides = [1, 1]} : vector<16x32xf32> to vector<2x32xf32>
    %417 = arith.addf %416, %405 : vector<2x32xf32>
    %418 = arith.negf %417 : vector<2x32xf32>
    %419 = math.exp %418 : vector<2x32xf32>
    %cst_152 = arith.constant 1.000000e+00 : f32
    %420 = vector.broadcast %cst_152 : f32 to vector<2x32xf32>
    %421 = arith.addf %420, %419 : vector<2x32xf32>
    %422 = arith.divf %420, %421 : vector<2x32xf32>
    %423 = vector.extract_strided_slice %283 {offsets = [8, 0], sizes = [2, 32], strides = [1, 1]} : vector<16x32xf32> to vector<2x32xf32>
    %424 = arith.mulf %415, %408 : vector<2x32xf32>
    %425 = arith.addf %423, %424 : vector<2x32xf32>
    %426 = math.tanh %425 : vector<2x32xf32>
    %cst_153 = arith.constant 1.000000e+00 : f32
    %427 = vector.broadcast %cst_153 : f32 to vector<2x32xf32>
    %428 = arith.subf %427, %422 : vector<2x32xf32>
    %429 = arith.mulf %428, %426 : vector<2x32xf32>
    %430 = arith.mulf %422, %403 : vector<2x32xf32>
    %431 = arith.addf %429, %430 : vector<2x32xf32>
    %cst_154 = arith.constant dense<0.000000e+00> : vector<2x32xf32>
    %432 = tpu.matmul %431, %285, %cst_154 {dimension_numbers = #tpu.dot_dimension_numbers<[1], [0], [0], [1], [0, 0, 1, 1], [], []>} : vector<2x32xf32>, vector<32x32xf32>, vector<2x32xf32> -> vector<2x32xf32>
    %cst_155 = arith.constant dense<0.000000e+00> : vector<2x32xf32>
    %433 = tpu.matmul %431, %287, %cst_155 {dimension_numbers = #tpu.dot_dimension_numbers<[1], [0], [0], [1], [0, 0, 1, 1], [], []>} : vector<2x32xf32>, vector<32x32xf32>, vector<2x32xf32> -> vector<2x32xf32>
    %cst_156 = arith.constant dense<0.000000e+00> : vector<2x32xf32>
    %434 = tpu.matmul %431, %289, %cst_156 {dimension_numbers = #tpu.dot_dimension_numbers<[1], [0], [0], [1], [0, 0, 1, 1], [], []>} : vector<2x32xf32>, vector<32x32xf32>, vector<2x32xf32> -> vector<2x32xf32>
    %435 = vector.broadcast %290 : vector<1x32xf32> to vector<2x32xf32>
    %436 = arith.addf %434, %435 : vector<2x32xf32>
    %437 = vector.extract_strided_slice %269 {offsets = [10, 0], sizes = [2, 32], strides = [1, 1]} : vector<16x32xf32> to vector<2x32xf32>
    %438 = arith.addf %437, %432 : vector<2x32xf32>
    %439 = arith.negf %438 : vector<2x32xf32>
    %440 = math.exp %439 : vector<2x32xf32>
    %cst_157 = arith.constant 1.000000e+00 : f32
    %441 = vector.broadcast %cst_157 : f32 to vector<2x32xf32>
    %442 = arith.addf %441, %440 : vector<2x32xf32>
    %443 = arith.divf %441, %442 : vector<2x32xf32>
    %444 = vector.extract_strided_slice %276 {offsets = [10, 0], sizes = [2, 32], strides = [1, 1]} : vector<16x32xf32> to vector<2x32xf32>
    %445 = arith.addf %444, %433 : vector<2x32xf32>
    %446 = arith.negf %445 : vector<2x32xf32>
    %447 = math.exp %446 : vector<2x32xf32>
    %cst_158 = arith.constant 1.000000e+00 : f32
    %448 = vector.broadcast %cst_158 : f32 to vector<2x32xf32>
    %449 = arith.addf %448, %447 : vector<2x32xf32>
    %450 = arith.divf %448, %449 : vector<2x32xf32>
    %451 = vector.extract_strided_slice %283 {offsets = [10, 0], sizes = [2, 32], strides = [1, 1]} : vector<16x32xf32> to vector<2x32xf32>
    %452 = arith.mulf %443, %436 : vector<2x32xf32>
    %453 = arith.addf %451, %452 : vector<2x32xf32>
    %454 = math.tanh %453 : vector<2x32xf32>
    %cst_159 = arith.constant 1.000000e+00 : f32
    %455 = vector.broadcast %cst_159 : f32 to vector<2x32xf32>
    %456 = arith.subf %455, %450 : vector<2x32xf32>
    %457 = arith.mulf %456, %454 : vector<2x32xf32>
    %458 = arith.mulf %450, %431 : vector<2x32xf32>
    %459 = arith.addf %457, %458 : vector<2x32xf32>
    %cst_160 = arith.constant dense<0.000000e+00> : vector<2x32xf32>
    %460 = tpu.matmul %459, %285, %cst_160 {dimension_numbers = #tpu.dot_dimension_numbers<[1], [0], [0], [1], [0, 0, 1, 1], [], []>} : vector<2x32xf32>, vector<32x32xf32>, vector<2x32xf32> -> vector<2x32xf32>
    %cst_161 = arith.constant dense<0.000000e+00> : vector<2x32xf32>
    %461 = tpu.matmul %459, %287, %cst_161 {dimension_numbers = #tpu.dot_dimension_numbers<[1], [0], [0], [1], [0, 0, 1, 1], [], []>} : vector<2x32xf32>, vector<32x32xf32>, vector<2x32xf32> -> vector<2x32xf32>
    %cst_162 = arith.constant dense<0.000000e+00> : vector<2x32xf32>
    %462 = tpu.matmul %459, %289, %cst_162 {dimension_numbers = #tpu.dot_dimension_numbers<[1], [0], [0], [1], [0, 0, 1, 1], [], []>} : vector<2x32xf32>, vector<32x32xf32>, vector<2x32xf32> -> vector<2x32xf32>
    %463 = vector.broadcast %290 : vector<1x32xf32> to vector<2x32xf32>
    %464 = arith.addf %462, %463 : vector<2x32xf32>
    %465 = vector.extract_strided_slice %269 {offsets = [12, 0], sizes = [2, 32], strides = [1, 1]} : vector<16x32xf32> to vector<2x32xf32>
    %466 = arith.addf %465, %460 : vector<2x32xf32>
    %467 = arith.negf %466 : vector<2x32xf32>
    %468 = math.exp %467 : vector<2x32xf32>
    %cst_163 = arith.constant 1.000000e+00 : f32
    %469 = vector.broadcast %cst_163 : f32 to vector<2x32xf32>
    %470 = arith.addf %469, %468 : vector<2x32xf32>
    %471 = arith.divf %469, %470 : vector<2x32xf32>
    %472 = vector.extract_strided_slice %276 {offsets = [12, 0], sizes = [2, 32], strides = [1, 1]} : vector<16x32xf32> to vector<2x32xf32>
    %473 = arith.addf %472, %461 : vector<2x32xf32>
    %474 = arith.negf %473 : vector<2x32xf32>
    %475 = math.exp %474 : vector<2x32xf32>
    %cst_164 = arith.constant 1.000000e+00 : f32
    %476 = vector.broadcast %cst_164 : f32 to vector<2x32xf32>
    %477 = arith.addf %476, %475 : vector<2x32xf32>
    %478 = arith.divf %476, %477 : vector<2x32xf32>
    %479 = vector.extract_strided_slice %283 {offsets = [12, 0], sizes = [2, 32], strides = [1, 1]} : vector<16x32xf32> to vector<2x32xf32>
    %480 = arith.mulf %471, %464 : vector<2x32xf32>
    %481 = arith.addf %479, %480 : vector<2x32xf32>
    %482 = math.tanh %481 : vector<2x32xf32>
    %cst_165 = arith.constant 1.000000e+00 : f32
    %483 = vector.broadcast %cst_165 : f32 to vector<2x32xf32>
    %484 = arith.subf %483, %478 : vector<2x32xf32>
    %485 = arith.mulf %484, %482 : vector<2x32xf32>
    %486 = arith.mulf %478, %459 : vector<2x32xf32>
    %487 = arith.addf %485, %486 : vector<2x32xf32>
    %cst_166 = arith.constant dense<0.000000e+00> : vector<2x32xf32>
    %488 = tpu.matmul %487, %285, %cst_166 {dimension_numbers = #tpu.dot_dimension_numbers<[1], [0], [0], [1], [0, 0, 1, 1], [], []>} : vector<2x32xf32>, vector<32x32xf32>, vector<2x32xf32> -> vector<2x32xf32>
    %cst_167 = arith.constant dense<0.000000e+00> : vector<2x32xf32>
    %489 = tpu.matmul %487, %287, %cst_167 {dimension_numbers = #tpu.dot_dimension_numbers<[1], [0], [0], [1], [0, 0, 1, 1], [], []>} : vector<2x32xf32>, vector<32x32xf32>, vector<2x32xf32> -> vector<2x32xf32>
    %cst_168 = arith.constant dense<0.000000e+00> : vector<2x32xf32>
    %490 = tpu.matmul %487, %289, %cst_168 {dimension_numbers = #tpu.dot_dimension_numbers<[1], [0], [0], [1], [0, 0, 1, 1], [], []>} : vector<2x32xf32>, vector<32x32xf32>, vector<2x32xf32> -> vector<2x32xf32>
    %491 = vector.broadcast %290 : vector<1x32xf32> to vector<2x32xf32>
    %492 = arith.addf %490, %491 : vector<2x32xf32>
    %493 = vector.extract_strided_slice %269 {offsets = [14, 0], sizes = [2, 32], strides = [1, 1]} : vector<16x32xf32> to vector<2x32xf32>
    %494 = arith.addf %493, %488 : vector<2x32xf32>
    %495 = arith.negf %494 : vector<2x32xf32>
    %496 = math.exp %495 : vector<2x32xf32>
    %cst_169 = arith.constant 1.000000e+00 : f32
    %497 = vector.broadcast %cst_169 : f32 to vector<2x32xf32>
    %498 = arith.addf %497, %496 : vector<2x32xf32>
    %499 = arith.divf %497, %498 : vector<2x32xf32>
    %500 = vector.extract_strided_slice %276 {offsets = [14, 0], sizes = [2, 32], strides = [1, 1]} : vector<16x32xf32> to vector<2x32xf32>
    %501 = arith.addf %500, %489 : vector<2x32xf32>
    %502 = arith.negf %501 : vector<2x32xf32>
    %503 = math.exp %502 : vector<2x32xf32>
    %cst_170 = arith.constant 1.000000e+00 : f32
    %504 = vector.broadcast %cst_170 : f32 to vector<2x32xf32>
    %505 = arith.addf %504, %503 : vector<2x32xf32>
    %506 = arith.divf %504, %505 : vector<2x32xf32>
    %507 = vector.extract_strided_slice %283 {offsets = [14, 0], sizes = [2, 32], strides = [1, 1]} : vector<16x32xf32> to vector<2x32xf32>
    %508 = arith.mulf %499, %492 : vector<2x32xf32>
    %509 = arith.addf %507, %508 : vector<2x32xf32>
    %510 = math.tanh %509 : vector<2x32xf32>
    %cst_171 = arith.constant 1.000000e+00 : f32
    %511 = vector.broadcast %cst_171 : f32 to vector<2x32xf32>
    %512 = arith.subf %511, %506 : vector<2x32xf32>
    %513 = arith.mulf %512, %510 : vector<2x32xf32>
    %514 = arith.mulf %506, %487 : vector<2x32xf32>
    %515 = arith.addf %513, %514 : vector<2x32xf32>
    %c0_172 = arith.constant 0 : index
    %c0_173 = arith.constant 0 : index
    %516 = vector.load %arg9[%c0_172, %c0_173] : memref<32x4xf32, #tpu.memory_space<vmem>>, vector<32x4xf32>
    %cst_174 = arith.constant dense<0.000000e+00> : vector<2x4xf32>
    %517 = tpu.matmul %515, %516, %cst_174 {dimension_numbers = #tpu.dot_dimension_numbers<[1], [0], [0], [1], [0, 0, 1, 1], [], []>} : vector<2x32xf32>, vector<32x4xf32>, vector<2x4xf32> -> vector<2x4xf32>
    %c0_175 = arith.constant 0 : index
    %c0_176 = arith.constant 0 : index
    %518 = vector.load %arg10[%c0_175, %c0_176] : memref<1x4xf32, #tpu.memory_space<vmem>>, vector<1x4xf32>
    %519 = vector.broadcast %518 : vector<1x4xf32> to vector<2x4xf32>
    %520 = arith.addf %517, %519 : vector<2x4xf32>
    %c0_177 = arith.constant 0 : index
    %c0_178 = arith.constant 0 : index
    %521 = vector.load %arg11[%c0_177, %c0_178] : memref<2x4xf32, #tpu.memory_space<vmem>>, vector<2x4xf32>
    tpu.vector_store %arg11[%c0_177, %c0_178], %520 {strides = array<i32>} : memref<2x4xf32, #tpu.memory_space<vmem>>, vector<2x4xf32>,
    return
  }
}

</mosaic_0001>

<bundles_post_ra>
// kernel: weather_gru_forward.1
= control target key start
LH: loop header
LB: loop body
LE: loop exit
PB: predicated region body
PF: predicated region fallthrough
CT: control target
= control target key end

     0   :  { %16 = vsyncpa [#allocation4], 0  ;;  %s7001_s0 = inlined_call_operand.vmem [shape: f32[16,4], index: 0, kind: input, shape index: {}]   ;;  %s7002_s1 = inlined_call_operand.hbm [shape: f32[3,4,32], index: 1, kind: input, shape index: {}]   ;;  %s7003_s2 = inlined_call_operand.hbm [shape: f32[3,32,32], index: 2, kind: input, shape index: {}]   ;;  %s7004_s3 = inlined_call_operand.hbm [shape: f32[3,1,32], index: 3, kind: input, shape index: {}]   ;;  %s7005_s4 = inlined_call_operand.vmem [shape: f32[1,32], index: 4, kind: input, shape index: {}]   ;;  %s7006_s5 = inlined_call_operand.hbm [shape: f32[3,32,32], index: 5, kind: input, shape index: {}]   ;;  %s7007_s6 = inlined_call_operand.vmem [shape: f32[3,32,32], index: 6, kind: input, shape index: {}]   ;;  %s7008_s7 = inlined_call_operand.vmem [shape: f32[3,1,32], index: 7, kind: input, shape index: {}]   ;;  %s7009_s8 = inlined_call_operand.vmem [shape: f32[1,32], index: 8, kind: input, shape index: {}]   ;;  %s7010_s9 = inlined_call_operand.vmem [shape: f32[32,4], index: 9, kind: input, shape index: {}]   ;;  %s7011_s10 = inlined_call_operand.hbm [shape: f32[1,4], index: 10, kind: input, shape index: {}]   ;;  %s7012_s11 = inlined_call_operand.hbm [shape: f32[2,4], index: 11, kind: output, shape index: {}]  }
   0x1   :  { %17 = vsyncpa [#allocation7], 0 }
   0x2   :  { %18 = vsyncpa [#allocation10], 0 }
   0x3   :  { %19 = vsyncpa [#allocation5], 0  ;;  %s6292_s17 = smov [#allocation6]   ;;  %s6152_s21 = scalar_lea.hbm %s7003_s2, 1536 }
   0x4   :  { %s39_s18 = sshll.u32 %s6292_s17, 4  ;;  %p6153_p0 = scmp.ne.s32.totalorder %s7003_s2, %s6152_s21  ;;  %s40_s18 = int_to_ptr.vmem [resolvable:$true] %s39_s18 }
   0x5   :  { %p6156_p1 = scmp.lt.u32.totalorder %s6152_s21, %s7003_s2 }
   0x7   :  { %p6158_p2 = pnand %p6156_p1, %p6153_p0 }
   0x9   :  { %6161 = shalt.err (!%p6158_p2)
}
   0xa   :  { %s6162_s26 = scalar_lea.vmem %s40_s18, 1536  ;;  %p6167_p4 = scmp.lt.s32.totalorder %s40_s18, %s40_s18 }
   0xb   :  { %p6163_p3 = scmp.ne.s32.totalorder %s40_s18, %s6162_s26  ;;  %p6168_p5 = scmp.lt.s32.totalorder %s6162_s26, %s6162_s26 }
   0xd   :  { %p6169_p6 = por %p6168_p5, %p6167_p4 }
   0xf   :  { %p6170_p7 = pnand %p6169_p6, %p6163_p3 }
  0x11   :  { %6173 = shalt.err (!%p6170_p7)
}
  0x12   :  { %s6293_s27 = smov 128   ;;  %s6294_s28 = smov 8  }
  0x13   :  { %45 = dma.hbm_to_vmem [thread:$0]  %s7003_s2, 1536, %s40_s18, [#allocation7], %s6293_s27, %s6293_s27, %s6294_s28  }
  0x14   :  { %s6295_s12 = smov [#allocation9]   ;;  %s6296_s14 = smov [#allocation3]  }
  0x15   :  { %s65_s13 = sshll.u32 %s6295_s12, 4  ;;  %s27_s15 = sshll.u32 %s6296_s14, 4  ;;  %s66_s13 = int_to_ptr.vmem [resolvable:$true] %s65_s13  ;;  %s28_s15 = int_to_ptr.vmem [resolvable:$true] %s27_s15 }
  0x16   :  { %s6174_s19 = scalar_lea.hbm %s7006_s5, 1536 }
  0x17   :  { %p6175_p8 = scmp.ne.s32.totalorder %s7006_s5, %s6174_s19  ;;  %p6178_p9 = scmp.lt.u32.totalorder %s6174_s19, %s7006_s5 }
  0x19   :  { %p6180_p10 = pnand %p6178_p9, %p6175_p8 }
  0x1b   :  { %6183 = shalt.err (!%p6180_p10)
}
  0x1c   :  { %s6184_s2 = scalar_lea.vmem %s66_s13, 1536  ;;  %p6189_p12 = scmp.lt.s32.totalorder %s66_s13, %s66_s13 }
  0x1d   :  { %p6185_p11 = scmp.ne.s32.totalorder %s66_s13, %s6184_s2  ;;  %p6190_p13 = scmp.lt.s32.totalorder %s6184_s2, %s6184_s2 }
  0x1f   :  { %p6191_p0 = por %p6190_p13, %p6189_p12 }
  0x21   :  { %p6192_p1 = pnand %p6191_p0, %p6185_p11 }
  0x23   :  { %6195 = shalt.err (!%p6192_p1)
}
  0x24   :  { %71 = dma.hbm_to_vmem [thread:$0]  %s7006_s5, 1536, %s66_s13, [#allocation10], %s6293_s27, %s6293_s27, %s6294_s28  }
  0x25   :  { %s6196_s29 = scalar_lea.hbm %s7002_s1, 192 }
  0x26   :  { %p6197_p2 = scmp.ne.s32.totalorder %s7002_s1, %s6196_s29  ;;  %p6200_p3 = scmp.lt.u32.totalorder %s6196_s29, %s7002_s1 }
  0x28   :  { %p6202_p4 = pnand %p6200_p3, %p6197_p2 }
  0x2a   :  { %6205 = shalt.err (!%p6202_p4)
}
  0x2b   :  { %s6206_s17 = scalar_lea.vmem %s28_s15, 192  ;;  %p6211_p6 = scmp.lt.s32.totalorder %s28_s15, %s28_s15 }
  0x2c   :  { %p6207_p5 = scmp.ne.s32.totalorder %s28_s15, %s6206_s17  ;;  %p6212_p7 = scmp.lt.s32.totalorder %s6206_s17, %s6206_s17 }
  0x2e   :  { %p6213_p8 = por %p6212_p7, %p6211_p6 }
  0x30   :  { %p6214_p9 = pnand %p6213_p8, %p6207_p5 }
  0x32   :  { %6217 = shalt.err (!%p6214_p9)
}
  0x33   :  { %s6297_s5 = smov 64   ;;  %s6298_s27 = smov 4  }
  0x34   :  { %33 = dma.hbm_to_vmem [thread:$0]  %s7002_s1, 192, %s28_s15, [#allocation4], %s6297_s5, %s6297_s5, %s6298_s27  }
  0x35   :  { %s6299_s19 = smov [#allocation8]   ;;  %s6218_s23 = scalar_lea.hbm %s7004_s3, 48 }
  0x36   :  { %s51_s20 = sshll.u32 %s6299_s19, 4  ;;  %p6219_p10 = scmp.ne.s32.totalorder %s7004_s3, %s6218_s23  ;;  %s52_s20 = int_to_ptr.vmem [resolvable:$true] %s51_s20 }
  0x37   :  { %p6222_p11 = scmp.lt.u32.totalorder %s6218_s23, %s7004_s3 }
  0x39   :  { %p6224_p12 = pnand %p6222_p11, %p6219_p10 }
  0x3b   :  { %6227 = shalt.err (!%p6224_p12)
}
  0x3c   :  { %s6228_s26 = scalar_lea.vmem %s52_s20, 48  ;;  %s6232_s1 = scalar_lea.vmem %s52_s20, 64 }
  0x3d   :  { %p6229_p13 = scmp.ne.s32.totalorder %s52_s20, %s6228_s26  ;;  %p6233_p0 = scmp.lt.s32.totalorder %s52_s20, %s52_s20 }
  0x3e   :  { %p6234_p1 = scmp.lt.s32.totalorder %s6232_s1, %s6228_s26 }
  0x40   :  { %p6235_p2 = por %p6234_p1, %p6233_p0 }
  0x42   :  { %p6236_p3 = pnand %p6235_p2, %p6229_p13 }
  0x44   :  { %6239 = shalt.err (!%p6236_p3)
}
  0x45   :  { %s6300_s15 = smov 16   ;;  %s6301_s29 = smov 1  }
  0x46   :  { %57 = dma.hbm_to_vmem [thread:$0]  %s7004_s3, 48, %s52_s20, [#allocation7], %s6300_s15, %s6300_s15, %s6301_s29  }
  0x47   :  { %s6302_s14 = smov [#allocation11]   ;;  %s6240_s27 = scalar_lea.hbm %s7011_s10, 16 }
  0x48   :  { %s86_s16 = sshll.u32 %s6302_s14, 4  ;;  %p6241_p4 = scmp.ne.s32.totalorder %s7011_s10, %s6240_s27  ;;  %s87_s16 = int_to_ptr.vmem [resolvable:$true] %s86_s16 }
  0x49   :  { %p6244_p5 = scmp.lt.u32.totalorder %s6240_s27, %s7011_s10 }
  0x4b   :  { %p6246_p6 = pnand %p6244_p5, %p6241_p4 }
  0x4d   :  { %6249 = shalt.err (!%p6246_p6)
}
  0x4e   :  { %s6250_s22 = scalar_lea.vmem %s87_s16, 16  ;;  %s6254_s3 = scalar_lea.vmem %s87_s16, 32 }
  0x4f   :  { %p6251_p7 = scmp.ne.s32.totalorder %s87_s16, %s6250_s22  ;;  %p6255_p8 = scmp.lt.s32.totalorder %s87_s16, %s87_s16 }
  0x50   :  { %p6256_p9 = scmp.lt.s32.totalorder %s6254_s3, %s6250_s22 }
  0x52   :  { %p6257_p10 = por %p6256_p9, %p6255_p8 }
  0x54   :  { %p6258_p11 = pnand %p6257_p10, %p6251_p7 }
  0x56   :  { %6261 = shalt.err (!%p6258_p11)
}
  0x57   :  { %89 = dma.hbm_to_vmem [thread:$0]  %s7011_s10, 16, %s87_s16, [#allocation10]  }
  0x58   :  { %6284 = dma.done.wait [#allocation4], 192  }
  0x59   :  { %6285 = vsyncadd [#allocation4], 4294967104 }
  0x5a   :  { %6286 = dma.done.wait [#allocation7], 1584  }
  0x5b   :  { %6287 = vsyncadd [#allocation7], 4294965712 }
  0x5c   :  { %6288 = dma.done.wait [#allocation10], 1552  }
  0x5d   :  { %6289 = vsyncadd [#allocation10], 4294965744  ;;  %vm122_vm0 = vcmask 1043456   ;;  %vm115_vm1 = vcmask 31744   ;;  %v107_v0 = vld [vmem:[#allocation3] sm:$0xf] }
  0x5e   :  { %v202_v1 = vld [vmem:[#allocation3 + $0x4] sm:$0xf]  ;;  %v105_v2 = vld [vmem:[%s7001_s0] sm:$0xff]  ;;  %5072 = vmatprep.subr.msk.mxu0 %vm122_vm0, %v107_v0  ;;  %v106_v3 = vld [vmem:[%s7001_s0 + $0x8] sm:$0xff]  ;;  %v6303_v12 = vmov 0.0|0.0   ;;  %vm6304_vm2 = vmmov 0  }
  0x5f   :  { %5077 = vmatprep.subr.msk.mxu1 %vm122_vm0, %v202_v1  ;;  %v290_v4 = vld [vmem:[#allocation3 + $0x8] sm:$0xf]  ;;  %v377_v5 = vld [vmem:[#allocation6] sm:$0xff]  ;;  %5073 = vmatpush3.msk.msra.mxu0 %vm122_vm0, %v107_v0  ;;  %v378_v6 = vld [vmem:[#allocation6 + $0x8] sm:$0xff]  ;;  %v6305_v19 = vmov 0.0   ;;  %vm392_vm3 = vcmask 261120  }
  0x60   :  { %5074 = vmatprep.mubr.msk.f32.mxu0 %vm115_vm1, %v105_v2  ;;  %v382_v7 = vld [vmem:[#allocation6 + $0x20] sm:$0xff]  ;;  %v383_v8 = vld [vmem:[#allocation6 + $0x28] sm:$0xff]  ;;  %5078 = vmatpush3.msk.msra.mxu1 %vm122_vm0, %v202_v1  ;;  %v6439_v9 = vpack.c.bf16 %v378_v6, %v377_v5  ;;  %v379_v10 = vld [vmem:[#allocation6 + $0x10] sm:$0xff]  ;;  %vm633_vm4 = vcmask 254976   ;;  %vm880_vm5 = vcmask 257026   ;;  %vm1128_vm6 = vcmask 259076  }
  0x61   :  { %5079 = vmatprep.mubr.msk.f32.mxu1 %vm115_vm1, %v105_v2  ;;  %v380_v11 = vld [vmem:[#allocation6 + $0x18] sm:$0xff]  ;;  %5075 = vmatmul.mubr.msk.f32.vlgmr.msra.gmra.mrb[0].mxu0 %vm115_vm1, %v106_v3  ;;  %v6445_v13 = vpack.c.bf16 %v383_v8, %v382_v7  ;;  %v384_v15 = vld [vmem:[#allocation6 + $0x30] sm:$0xff]  ;;  %v387_v17 = vld [vmem:[#allocation6 + $0x40] sm:$0xff]  ;;  %vm1376_vm7 = vcmask 261126   ;;  %vm4672_vm8 = vcmask 25600  }
  0x62   :  { %5080 = vmatmul.mubr.msk.f32.vlgmr.msra.gmra.mrb[0].mxu1 %vm115_vm1, %v106_v3  ;;  %5659 = vmatprep.subr.bf16.mxu1 %v6303_v12  ;;  %v6449_v14 = vpack.c.bf16 %v380_v11, %v379_v10  ;;  %v385_v16 = vld [vmem:[#allocation6 + $0x38] sm:$0xff]  ;;  %v388_v18 = vld [vmem:[#allocation6 + $0x48] sm:$0xff]  ;;  %v389_v22 = vld [vmem:[#allocation6 + $0x50] sm:$0xff] }
  0x63   :  { %5082 = vmatprep.subr.msk.mxu0 %vm122_vm0, %v290_v4  ;;  %5661 = vmatpush3.bf16.msra.mxu1 %v6439_v9  ;;  %v6458_v20 = vpack.c.bf16 %v385_v16, %v384_v15  ;;  %v6462_v21 = vpack.c.bf16 %v388_v18, %v387_v17  ;;  %v390_v23 = vld [vmem:[#allocation6 + $0x58] sm:$0xff]  ;;  %v4695_v25 = vld [vmem:[#allocation8 + $0x1] ss:$0 sm:$0xff]  ;;  %v4691_v26 = vld [vmem:[#allocation8] ss:$0 sm:$0xff] }
  0x64   :  { %5083 = vmatpush3.msk.msra.mxu0 %vm122_vm0, %v290_v4  ;;  %5084 = vmatprep.mubr.msk.f32.mxu0 %vm115_vm1, %v105_v2  ;;  %v6470_v24 = vpack.c.bf16 %v390_v23, %v389_v22  ;;  %v4699_v33 = vld [vmem:[#allocation8 + $0x2] ss:$0 sm:$0xff]  ;;  %v6507_v52 = vld [vmem:[%s7005_s4] ss:$0 sm:$0xff] }
  0x65   :  { %5665 = vmatprep.subr.bf16.mxu0 %v6303_v12  ;;  %5085 = vmatmul.mubr.msk.f32.vlgmr.msra.gmra.mrb[2].mxu0 %vm115_vm1, %v106_v3 }
  0x66   :  { %5662 = vmatprep.subr.bf16.mxu1 %v6303_v12  ;;  %5667 = vmatpush3.bf16.msra.mxu0 %v6445_v13 }
  0x67   :  { %5095 = vmatprep.mubr.msk.f32.mxu1 %vm6304_vm2, %v6305_v19  ;;  %5664 = vmatpush3.bf16.msra.mxu1 %v6449_v14 }
  0x68   :  { %5668 = vmatprep.subr.bf16.mxu0 %v6303_v12  ;;  %5106 = vmatprep.mubr.msk.f32.mxu0 %vm6304_vm2, %v6305_v19 }
  0x69   :  { %5671 = vmatprep.subr.bf16.mxu1 %v6303_v12 }
  0x6a   :  { %5096 = vmatmul.mubr.f32.vlgmr.msra.gmra.mrb[2].mxu1 %v6305_v19  ;;  %5670 = vmatpush3.bf16.msra.mxu0 %v6458_v20 }
  0x6b   :  { %5673 = vmatpush3.bf16.msra.mxu1 %v6462_v21  ;;  %5117 = vmatprep.mubr.msk.f32.mxu1 %vm6304_vm2, %v6305_v19 }
  0x6c   :  { %5674 = vmatprep.subr.bf16.mxu1 %v6303_v12  ;;  %5677 = vmatprep.subr.bf16.mxu0 %v6303_v12 }
  0x6d   :  { %5107 = vmatmul.mubr.f32.vlgmr.msra.gmra.mrb[4].mxu0 %v6305_v19 }
  0x6e   :  { %5679 = vmatpush3.bf16.msra.mxu0 %v6439_v9  ;;  %5128 = vmatprep.mubr.msk.f32.mxu0 %vm6304_vm2, %v6305_v19 }
  0x6f   :  { %5676 = vmatpush3.bf16.msra.mxu1 %v6470_v24  ;;  %5680 = vmatprep.subr.bf16.mxu0 %v6303_v12 }
  0x70   :  { %5683 = vmatprep.subr.bf16.mxu1 %v6303_v12 }
  0x72   :  { %5118 = vmatmul.mubr.f32.vlgmr.msra.gmra.mrb[4].mxu1 %v6305_v19  ;;  %5682 = vmatpush3.bf16.msra.mxu0 %v6449_v14 }
  0x73   :  { %5685 = vmatpush3.bf16.msra.mxu1 %v6445_v13  ;;  %5139 = vmatprep.mubr.msk.f32.mxu1 %vm6304_vm2, %v6305_v19 }
  0x74   :  { %5686 = vmatprep.subr.bf16.mxu1 %v6303_v12  ;;  %5689 = vmatprep.subr.bf16.mxu0 %v6303_v12 }
  0x77   :  { %5688 = vmatpush3.bf16.msra.mxu1 %v6458_v20 }
  0x78   :  { %5695 = vmatprep.subr.bf16.mxu1 %v6303_v12 }
 0x134   :  { %v5076_v28 = vpop.f32.mrb[0].mxu0 }
 0x135   :  { %v5081_v27 = vpop.f32.mrb[0].mxu1  ;;  %v6494_v31 = vadd.f32 %v5076_v28, %v4691_v26  ;;  %v192_v32 = vpop.f32.mrb[1].mxu0 }
 0x136   :  { %v6492_v29 = vadd.f32 %v5081_v27, %v4695_v25  ;;  %v280_v30 = vpop.f32.mrb[1].mxu1  ;;  %v6498_v37 = vadd.f32 %v4691_v26, %v192_v32 }
 0x137   :  { %v6501_v41 = vadd.f32 %v4695_v25, %v280_v30 }
 0x138   :  { %v5086_v34 = vpop.f32.mrb[2].mxu0 }
 0x139   :  { %v6496_v35 = vadd.f32 %v5086_v34, %v4699_v33  ;;  %v368_v36 = vpop.f32.mrb[3].mxu0 }
 0x13a   :  { %v6510_v56 = vadd.f32 %v4699_v33, %v368_v36 }
 0x13d   :  { %v462_v38 = vpop.f32.mrb[2].mxu1 }
 0x13e   :  { %v612_v39 = vadd.f32 %v462_v38, %v6498_v37  ;;  %v5097_v40 = vpop.f32.mrb[3].mxu1 }
 0x140   :  { %v4704_v42 = vmul.f32 -1.442695, %v612_v39  ;;  %v532_v43 = vpop.f32.mrb[4].mxu0 }
 0x141   :  { %v619_v44 = vadd.f32 %v532_v43, %v6501_v41  ;;  %v5108_v45 = vpop.f32.mrb[5].mxu0 }
 0x142   :  { %5992 = vpow2.f32 %v4704_v42 }
 0x143   :  { %v4705_v46 = vmul.f32 -1.442695, %v619_v44 }
 0x145   :  { %v608_v47 = vpop.f32.mrb[4].mxu1  ;;  %5994 = vpow2.f32 %v4705_v46 }
 0x146   :  { %v5119_v48 = vpop.f32.mrb[5].mxu1  ;;  %v609_v54 = vadd.f32 %v6507_v52, %v608_v47 }
 0x14c   :  { %v5993_v49 = vpop.eup %5992 }
 0x14d   :  { %v616_v50 = vadd.f32 1.0, %v5993_v49 }
 0x14f   :  { %5996 = vrcp.f32 %v616_v50  ;;  %v5995_v51 = vpop.eup %5994 }
 0x150   :  { %v623_v53 = vadd.f32 1.0, %v5995_v51 }
 0x152   :  { %5998 = vrcp.f32 %v623_v53 }
 0x159   :  { %v5997_v55 = vpop.eup %5996 }
 0x15a   :  { %v626_v57 = vmul.f32 %v5997_v55, %v609_v54 }
 0x15c   :  { %v627_v58 = vadd.f32 %v626_v57, %v6510_v56  ;;  %v5999_v59 = vpop.eup %5998 }
 0x15d   :  { %v629_v60 = vsub.f32 1.0, %v5999_v59  ;;  %v631_v63 = vmul.f32 0.0, %v5999_v59 }
 0x15e   :  { %6000 = vtanh.f32 %v627_v58 }
 0x168   :  { %v6001_v61 = vpop.eup %6000 }
 0x169   :  { %v630_v62 = vmul.f32 %v6001_v61, %v629_v60 }
 0x16b   :  { %v632_v0 = vadd.f32 %v631_v63, %v630_v62 }
 0x16d   :  { %634 = vst.msk [vmem:[#allocation2] sm:$0x3] %vm633_vm4, %v632_v0  ;;  %5129 = vmatmul.mubr.msk.f32.vlgmr.msra.gmra.mrb[6].mxu0 %vm392_vm3, %v632_v0  ;;  %5140 = vmatmul.mubr.msk.f32.vlgmr.msra.gmra.mrb[6].mxu1 %vm392_vm3, %v632_v0  ;;  %v876_v28 = vrot.slane %v632_v0, 6 }
 0x16e   :  { %5691 = vmatpush3.bf16.msra.mxu0 %v6462_v21  ;;  %5150 = vmatprep.mubr.msk.f32.mxu0 %vm6304_vm2, %v6305_v19 }
 0x16f   :  { %5692 = vmatprep.subr.bf16.mxu0 %v6303_v12  ;;  %5697 = vmatpush3.bf16.msra.mxu1 %v6439_v9 }
 0x170   :  { %5698 = vmatprep.subr.bf16.mxu1 %v6303_v12  ;;  %5161 = vmatprep.mubr.msk.f32.mxu1 %vm6304_vm2, %v6305_v19 }
 0x172   :  { %5694 = vmatpush3.bf16.msra.mxu0 %v6470_v24 }
 0x173   :  { %5701 = vmatprep.subr.bf16.mxu0 %v6303_v12  ;;  %5700 = vmatpush3.bf16.msra.mxu1 %v6449_v14 }
 0x174   :  { %5707 = vmatprep.subr.bf16.mxu1 %v6303_v12 }
 0x175   :  { %5151 = vmatmul.mubr.msk.f32.vlgmr.msra.gmra.mrb[8].mxu0 %vm392_vm3, %v632_v0 }
 0x176   :  { %5703 = vmatpush3.bf16.msra.mxu0 %v6445_v13  ;;  %5172 = vmatprep.mubr.msk.f32.mxu0 %vm6304_vm2, %v6305_v19 }
 0x177   :  { %5704 = vmatprep.subr.bf16.mxu0 %v6303_v12 }
 0x17a   :  { %5706 = vmatpush3.bf16.msra.mxu0 %v6458_v20 }
 0x17b   :  { %5713 = vmatprep.subr.bf16.mxu0 %v6303_v12 }
 0x240   :  { %v704_v1 = vpop.f32.mrb[6].mxu0  ;;  %v774_v2 = vpop.f32.mrb[6].mxu1 }
 0x241   :  { %v849_v3 = vrot.slane %v704_v1, 6  ;;  %v859_v4 = vrot.slane %v774_v2, 6  ;;  %v5130_v5 = vpop.f32.mrb[7].mxu0  ;;  %v5141_v6 = vpop.f32.mrb[7].mxu1 }
 0x243   :  { %v851_v7 = vadd.f32 %v849_v3, %v6498_v37  ;;  %v861_v8 = vadd.f32 %v859_v4, %v6501_v41 }
 0x245   :  { %v4709_v10 = vmul.f32 -1.442695, %v851_v7  ;;  %v4710_v11 = vmul.f32 -1.442695, %v861_v8 }
 0x247   :  { %6002 = vpow2.f32 %v4709_v10 }
 0x248   :  { %6004 = vpow2.f32 %v4710_v11  ;;  %v844_v15 = vpop.f32.mrb[8].mxu0 }
 0x249   :  { %v5152_v16 = vpop.f32.mrb[9].mxu0  ;;  %v845_v25 = vadd.f32 %v6507_v52, %v844_v15 }
 0x24b   :  { %v869_v26 = vrot.slane %v845_v25, 6 }
 0x251   :  { %v6003_v17 = vpop.eup %6002 }
 0x252   :  { %v6005_v18 = vpop.eup %6004  ;;  %v855_v22 = vadd.f32 1.0, %v6003_v17 }
 0x253   :  { %v865_v23 = vadd.f32 1.0, %v6005_v18 }
 0x254   :  { %6006 = vrcp.f32 %v855_v22 }
 0x255   :  { %6008 = vrcp.f32 %v865_v23 }
 0x25e   :  { %v6007_v27 = vpop.eup %6006 }
 0x25f   :  { %v6009_v30 = vpop.eup %6008  ;;  %v871_v32 = vmul.f32 %v6007_v27, %v869_v26 }
 0x260   :  { %v878_v33 = vmul.f32 %v6009_v30, %v876_v28  ;;  %v874_v36 = vsub.f32 1.0, %v6009_v30 }
 0x261   :  { %v872_v34 = vadd.f32 %v871_v32, %v6510_v56 }
 0x263   :  { %6010 = vtanh.f32 %v872_v34 }
 0x26d   :  { %v6011_v38 = vpop.eup %6010 }
 0x26e   :  { %v875_v39 = vmul.f32 %v6011_v38, %v874_v36 }
 0x270   :  { %v879_v40 = vadd.f32 %v878_v33, %v875_v39 }
 0x272   :  { %881 = vst.msk [vmem:[#allocation2] sm:$0xc] %vm880_vm5, %v879_v40  ;;  %v883_v42 = vrot.slane %v879_v40, 2  ;;  %v1124_v0 = vrot.slane %v879_v40, 6 }
 0x274   :  { %5162 = vmatmul.mubr.msk.f32.vlgmr.msra.gmra.mrb[8].mxu1 %vm392_vm3, %v883_v42  ;;  %5173 = vmatmul.mubr.msk.f32.vlgmr.msra.gmra.mrb[10].mxu0 %vm392_vm3, %v883_v42 }
 0x275   :  { %5709 = vmatpush3.bf16.msra.mxu1 %v6462_v21  ;;  %5183 = vmatprep.mubr.msk.f32.mxu1 %vm6304_vm2, %v6305_v19 }
 0x276   :  { %5710 = vmatprep.subr.bf16.mxu1 %v6303_v12  ;;  %5715 = vmatpush3.bf16.msra.mxu0 %v6439_v9 }
 0x277   :  { %5716 = vmatprep.subr.bf16.mxu0 %v6303_v12  ;;  %5194 = vmatprep.mubr.msk.f32.mxu0 %vm6304_vm2, %v6305_v19 }
 0x279   :  { %5712 = vmatpush3.bf16.msra.mxu1 %v6470_v24 }
 0x27a   :  { %5719 = vmatprep.subr.bf16.mxu1 %v6303_v12  ;;  %5718 = vmatpush3.bf16.msra.mxu0 %v6449_v14 }
 0x27b   :  { %5725 = vmatprep.subr.bf16.mxu0 %v6303_v12 }
 0x27c   :  { %5184 = vmatmul.mubr.msk.f32.vlgmr.msra.gmra.mrb[10].mxu1 %vm392_vm3, %v883_v42 }
 0x27d   :  { %5721 = vmatpush3.bf16.msra.mxu1 %v6445_v13  ;;  %5205 = vmatprep.mubr.msk.f32.mxu1 %vm6304_vm2, %v6305_v19 }
 0x27e   :  { %5722 = vmatprep.subr.bf16.mxu1 %v6303_v12 }
 0x281   :  { %5724 = vmatpush3.bf16.msra.mxu1 %v6458_v20 }
 0x282   :  { %5731 = vmatprep.subr.bf16.mxu1 %v6303_v12 }
 0x347   :  { %v952_v43 = vpop.f32.mrb[8].mxu1  ;;  %v1022_v44 = vpop.f32.mrb[10].mxu0 }
 0x348   :  { %v1097_v45 = vrot.slane %v952_v43, 4  ;;  %v1107_v46 = vrot.slane %v1022_v44, 4  ;;  %v5163_v47 = vpop.f32.mrb[9].mxu1  ;;  %v5174_v48 = vpop.f32.mrb[11].mxu0 }
 0x34a   :  { %v1099_v49 = vadd.f32 %v1097_v45, %v6498_v37  ;;  %v1109_v50 = vadd.f32 %v1107_v46, %v6501_v41 }
 0x34c   :  { %v4714_v51 = vmul.f32 -1.442695, %v1099_v49  ;;  %v4715_v53 = vmul.f32 -1.442695, %v1109_v50 }
 0x34e   :  { %6012 = vpow2.f32 %v4714_v51 }
 0x34f   :  { %6014 = vpow2.f32 %v4715_v53  ;;  %v1092_v54 = vpop.f32.mrb[10].mxu1 }
 0x350   :  { %v5185_v55 = vpop.f32.mrb[11].mxu1  ;;  %v1093_v61 = vadd.f32 %v6507_v52, %v1092_v54 }
 0x352   :  { %v1117_v62 = vrot.slane %v1093_v61, 4 }
 0x358   :  { %v6013_v57 = vpop.eup %6012 }
 0x359   :  { %v6015_v58 = vpop.eup %6014  ;;  %v1103_v59 = vadd.f32 1.0, %v6013_v57 }
 0x35a   :  { %v1113_v60 = vadd.f32 1.0, %v6015_v58 }
 0x35b   :  { %6016 = vrcp.f32 %v1103_v59 }
 0x35c   :  { %6018 = vrcp.f32 %v1113_v60 }
 0x365   :  { %v6017_v63 = vpop.eup %6016 }
 0x366   :  { %v6019_v1 = vpop.eup %6018  ;;  %v1119_v2 = vmul.f32 %v6017_v63, %v1117_v62 }
 0x367   :  { %v1126_v3 = vmul.f32 %v6019_v1, %v1124_v0  ;;  %v1122_v5 = vsub.f32 1.0, %v6019_v1 }
 0x368   :  { %v1120_v4 = vadd.f32 %v1119_v2, %v6510_v56 }
 0x36a   :  { %6020 = vtanh.f32 %v1120_v4 }
 0x374   :  { %v6021_v6 = vpop.eup %6020 }
 0x375   :  { %v1123_v7 = vmul.f32 %v6021_v6, %v1122_v5 }
 0x377   :  { %v1127_v8 = vadd.f32 %v1126_v3, %v1123_v7 }
 0x379   :  { %1129 = vst.msk [vmem:[#allocation2] sm:$0x30] %vm1128_vm6, %v1127_v8  ;;  %v1131_v10 = vrot.slane %v1127_v8, 4  ;;  %v1372_v42 = vrot.slane %v1127_v8, 6 }
 0x37b   :  { %5195 = vmatmul.mubr.msk.f32.vlgmr.msra.gmra.mrb[12].mxu0 %vm392_vm3, %v1131_v10  ;;  %5206 = vmatmul.mubr.msk.f32.vlgmr.msra.gmra.mrb[12].mxu1 %vm392_vm3, %v1131_v10 }
 0x37c   :  { %5727 = vmatpush3.bf16.msra.mxu0 %v6462_v21  ;;  %5216 = vmatprep.mubr.msk.f32.mxu0 %vm6304_vm2, %v6305_v19 }
 0x37d   :  { %5728 = vmatprep.subr.bf16.mxu0 %v6303_v12  ;;  %5733 = vmatpush3.bf16.msra.mxu1 %v6439_v9 }
 0x37e   :  { %5734 = vmatprep.subr.bf16.mxu1 %v6303_v12  ;;  %5227 = vmatprep.mubr.msk.f32.mxu1 %vm6304_vm2, %v6305_v19 }
 0x380   :  { %5730 = vmatpush3.bf16.msra.mxu0 %v6470_v24 }
 0x381   :  { %5737 = vmatprep.subr.bf16.mxu0 %v6303_v12  ;;  %5736 = vmatpush3.bf16.msra.mxu1 %v6449_v14 }
 0x382   :  { %5743 = vmatprep.subr.bf16.mxu1 %v6303_v12 }
 0x383   :  { %5217 = vmatmul.mubr.msk.f32.vlgmr.msra.gmra.mrb[14].mxu0 %vm392_vm3, %v1131_v10 }
 0x384   :  { %5739 = vmatpush3.bf16.msra.mxu0 %v6445_v13  ;;  %5238 = vmatprep.mubr.msk.f32.mxu0 %vm6304_vm2, %v6305_v19 }
 0x385   :  { %5740 = vmatprep.subr.bf16.mxu0 %v6303_v12 }
 0x388   :  { %5742 = vmatpush3.bf16.msra.mxu0 %v6458_v20 }
 0x389   :  { %5749 = vmatprep.subr.bf16.mxu0 %v6303_v12 }
 0x44e   :  { %v1200_v11 = vpop.f32.mrb[12].mxu0  ;;  %v1270_v15 = vpop.f32.mrb[12].mxu1 }
 0x44f   :  { %v1345_v16 = vrot.slane %v1200_v11, 2  ;;  %v1355_v17 = vrot.slane %v1270_v15, 2  ;;  %v5196_v18 = vpop.f32.mrb[13].mxu0  ;;  %v5207_v22 = vpop.f32.mrb[13].mxu1 }
 0x451   :  { %v1347_v23 = vadd.f32 %v1345_v16, %v6498_v37  ;;  %v1357_v25 = vadd.f32 %v1355_v17, %v6501_v41 }
 0x453   :  { %v4719_v26 = vmul.f32 -1.442695, %v1347_v23  ;;  %v4720_v27 = vmul.f32 -1.442695, %v1357_v25 }
 0x455   :  { %6022 = vpow2.f32 %v4719_v26 }
 0x456   :  { %6024 = vpow2.f32 %v4720_v27  ;;  %v1340_v28 = vpop.f32.mrb[14].mxu0 }
 0x457   :  { %v5218_v30 = vpop.f32.mrb[15].mxu0  ;;  %v1341_v38 = vadd.f32 %v6507_v52, %v1340_v28 }
 0x459   :  { %v1365_v39 = vrot.slane %v1341_v38, 2 }
 0x45f   :  { %v6023_v32 = vpop.eup %6022 }
 0x460   :  { %v6025_v33 = vpop.eup %6024  ;;  %v1351_v34 = vadd.f32 1.0, %v6023_v32 }
 0x461   :  { %v1361_v36 = vadd.f32 1.0, %v6025_v33 }
 0x462   :  { %6026 = vrcp.f32 %v1351_v34 }
 0x463   :  { %6028 = vrcp.f32 %v1361_v36 }
 0x46c   :  { %v6027_v40 = vpop.eup %6026 }
 0x46d   :  { %v6029_v37 = vpop.eup %6028  ;;  %v1367_v43 = vmul.f32 %v6027_v40, %v1365_v39 }
 0x46e   :  { %v1374_v41 = vmul.f32 %v6029_v37, %v1372_v42  ;;  %v1370_v45 = vsub.f32 1.0, %v6029_v37 }
 0x46f   :  { %v1368_v44 = vadd.f32 %v1367_v43, %v6510_v56 }
 0x471   :  { %6030 = vtanh.f32 %v1368_v44 }
 0x47b   :  { %v6031_v46 = vpop.eup %6030 }
 0x47c   :  { %v1371_v47 = vmul.f32 %v6031_v46, %v1370_v45 }
 0x47e   :  { %v1375_v48 = vadd.f32 %v1374_v41, %v1371_v47 }
 0x480   :  { %1377 = vst.msk [vmem:[#allocation2] sm:$0xc0] %vm1376_vm7, %v1375_v48  ;;  %v1379_v49 = vrot.slane %v1375_v48, 6 }
 0x482   :  { %5228 = vmatmul.mubr.msk.f32.vlgmr.msra.gmra.mrb[14].mxu1 %vm392_vm3, %v1379_v49  ;;  %5239 = vmatmul.mubr.msk.f32.vlgmr.msra.gmra.mrb[16].mxu0 %vm392_vm3, %v1379_v49 }
 0x483   :  { %5745 = vmatpush3.bf16.msra.mxu1 %v6462_v21  ;;  %5249 = vmatprep.mubr.msk.f32.mxu1 %vm6304_vm2, %v6305_v19 }
 0x484   :  { %5746 = vmatprep.subr.bf16.mxu1 %v6303_v12  ;;  %5751 = vmatpush3.bf16.msra.mxu0 %v6439_v9 }
 0x485   :  { %5752 = vmatprep.subr.bf16.mxu0 %v6303_v12  ;;  %5260 = vmatprep.mubr.msk.f32.mxu0 %vm6304_vm2, %v6305_v19 }
 0x487   :  { %5748 = vmatpush3.bf16.msra.mxu1 %v6470_v24 }
 0x488   :  { %5755 = vmatprep.subr.bf16.mxu1 %v6303_v12  ;;  %5754 = vmatpush3.bf16.msra.mxu0 %v6449_v14 }
 0x489   :  { %5761 = vmatprep.subr.bf16.mxu0 %v6303_v12 }
 0x48a   :  { %5250 = vmatmul.mubr.msk.f32.vlgmr.msra.gmra.mrb[16].mxu1 %vm392_vm3, %v1379_v49 }
 0x48b   :  { %5757 = vmatpush3.bf16.msra.mxu1 %v6445_v13  ;;  %5271 = vmatprep.mubr.msk.f32.mxu1 %vm6304_vm2, %v6305_v19 }
 0x48c   :  { %5758 = vmatprep.subr.bf16.mxu1 %v6303_v12 }
 0x48f   :  { %5760 = vmatpush3.bf16.msra.mxu1 %v6458_v20 }
 0x490   :  { %5767 = vmatprep.subr.bf16.mxu1 %v6303_v12 }
 0x555   :  { %v1448_v56 = vpop.f32.mrb[14].mxu1  ;;  %v1518_v50 = vpop.f32.mrb[16].mxu0 }
 0x556   :  { %v1592_v51 = vadd.f32 %v1448_v56, %v6494_v31  ;;  %v5229_v53 = vpop.f32.mrb[15].mxu1  ;;  %v5240_v54 = vpop.f32.mrb[17].mxu0  ;;  %v1599_v57 = vadd.f32 %v1518_v50, %v6492_v29 }
 0x558   :  { %v4724_v55 = vmul.f32 -1.442695, %v1592_v51  ;;  %v4725_v58 = vmul.f32 -1.442695, %v1599_v57 }
 0x55a   :  { %6032 = vpow2.f32 %v4724_v55 }
 0x55b   :  { %6034 = vpow2.f32 %v4725_v58 }
 0x55d   :  { %v1588_v59 = vpop.f32.mrb[16].mxu1 }
 0x55e   :  { %v5251_v60 = vpop.f32.mrb[17].mxu1  ;;  %v1589_v1 = vadd.f32 %v6507_v52, %v1588_v59 }
 0x564   :  { %v6033_v61 = vpop.eup %6032 }
 0x565   :  { %v1596_v62 = vadd.f32 1.0, %v6033_v61  ;;  %v6035_v63 = vpop.eup %6034 }
 0x566   :  { %v1603_v0 = vadd.f32 1.0, %v6035_v63 }
 0x567   :  { %6036 = vrcp.f32 %v1596_v62 }
 0x568   :  { %6038 = vrcp.f32 %v1603_v0 }
 0x571   :  { %v6037_v2 = vpop.eup %6036 }
 0x572   :  { %v1606_v3 = vmul.f32 %v6037_v2, %v1589_v1  ;;  %v6039_v5 = vpop.eup %6038 }
 0x573   :  { %v1609_v6 = vsub.f32 1.0, %v6039_v5  ;;  %v1612_v10 = vmul.f32 %v6039_v5, %v1379_v49 }
 0x574   :  { %v1607_v4 = vadd.f32 %v1606_v3, %v6496_v35 }
 0x576   :  { %6040 = vtanh.f32 %v1607_v4 }
 0x580   :  { %v6041_v7 = vpop.eup %6040 }
 0x581   :  { %v1610_v8 = vmul.f32 %v6041_v7, %v1609_v6 }
 0x583   :  { %v1613_v11 = vadd.f32 %v1612_v10, %v1610_v8 }
 0x585   :  { %1614 = vst.msk [vmem:[#allocation2 + $0x8] sm:$0x3] %vm633_vm4, %v1613_v11  ;;  %5261 = vmatmul.mubr.msk.f32.vlgmr.msra.gmra.mrb[18].mxu0 %vm392_vm3, %v1613_v11  ;;  %5272 = vmatmul.mubr.msk.f32.vlgmr.msra.gmra.mrb[18].mxu1 %vm392_vm3, %v1613_v11  ;;  %v1856_v37 = vrot.slane %v1613_v11, 6 }
 0x586   :  { %5763 = vmatpush3.bf16.msra.mxu0 %v6462_v21  ;;  %5282 = vmatprep.mubr.msk.f32.mxu0 %vm6304_vm2, %v6305_v19 }
 0x587   :  { %5764 = vmatprep.subr.bf16.mxu0 %v6303_v12  ;;  %5769 = vmatpush3.bf16.msra.mxu1 %v6439_v9 }
 0x588   :  { %5770 = vmatprep.subr.bf16.mxu1 %v6303_v12  ;;  %5293 = vmatprep.mubr.msk.f32.mxu1 %vm6304_vm2, %v6305_v19 }
 0x58a   :  { %5766 = vmatpush3.bf16.msra.mxu0 %v6470_v24 }
 0x58b   :  { %5773 = vmatprep.subr.bf16.mxu0 %v6303_v12  ;;  %5772 = vmatpush3.bf16.msra.mxu1 %v6449_v14 }
 0x58c   :  { %5779 = vmatprep.subr.bf16.mxu1 %v6303_v12 }
 0x58d   :  { %5283 = vmatmul.mubr.msk.f32.vlgmr.msra.gmra.mrb[20].mxu0 %vm392_vm3, %v1613_v11 }
 0x58e   :  { %5775 = vmatpush3.bf16.msra.mxu0 %v6445_v13  ;;  %5304 = vmatprep.mubr.msk.f32.mxu0 %vm6304_vm2, %v6305_v19 }
 0x58f   :  { %5776 = vmatprep.subr.bf16.mxu0 %v6303_v12 }
 0x592   :  { %5778 = vmatpush3.bf16.msra.mxu0 %v6458_v20 }
 0x593   :  { %5785 = vmatprep.subr.bf16.mxu0 %v6303_v12 }
 0x658   :  { %v1684_v15 = vpop.f32.mrb[18].mxu0  ;;  %v1754_v16 = vpop.f32.mrb[18].mxu1 }
 0x659   :  { %v1829_v17 = vrot.slane %v1684_v15, 6  ;;  %v1839_v18 = vrot.slane %v1754_v16, 6  ;;  %v5262_v22 = vpop.f32.mrb[19].mxu0  ;;  %v5273_v23 = vpop.f32.mrb[19].mxu1 }
 0x65a   :  { %v2358_v22 = vld [vmem:[#allocation9 + $0x8] sm:$0xff]  ;;  %v2450_v23 = vld [vmem:[#allocation9 + $0x20] sm:$0xff] }
 0x65b   :  { %v1831_v25 = vadd.f32 %v1829_v17, %v6494_v31  ;;  %v1841_v26 = vadd.f32 %v1839_v18, %v6492_v29  ;;  %v6675_v17 = vld [vmem:[#allocation2] sm:$0xff] }
 0x65c   :  { %v2357_v18 = vld [vmem:[#allocation9] sm:$0xff] }
 0x65d   :  { %v4729_v27 = vmul.f32 -1.442695, %v1831_v25  ;;  %v4730_v28 = vmul.f32 -1.442695, %v1841_v26  ;;  %v5803_v25 = vpack.c.bf16 %v2358_v22, %v2357_v18  ;;  %v4759_v18 = vld [vmem:[%s7007_s6 + $0x58] sm:$0xff] }
 0x65f   :  { %6042 = vpow2.f32 %v4729_v27  ;;  %v2359_v27 = vld [vmem:[#allocation9 + $0x10] sm:$0xff] }
 0x660   :  { %6044 = vpow2.f32 %v4730_v28  ;;  %v1824_v30 = vpop.f32.mrb[20].mxu0  ;;  %v2360_v28 = vld [vmem:[#allocation9 + $0x18] sm:$0xff] }
 0x661   :  { %v5284_v32 = vpop.f32.mrb[21].mxu0  ;;  %v1825_v39 = vadd.f32 %v6507_v52, %v1824_v30  ;;  %v2452_v30 = vld [vmem:[#allocation9 + $0x30] sm:$0xff] }
 0x662   :  { %v5807_v32 = vpack.c.bf16 %v2360_v28, %v2359_v27 }
 0x663   :  { %v1849_v40 = vrot.slane %v1825_v39, 6 }
 0x669   :  { %v6043_v33 = vpop.eup %6042 }
 0x66a   :  { %v6045_v34 = vpop.eup %6044  ;;  %v1835_v36 = vadd.f32 1.0, %v6043_v33  ;;  %v2453_v33 = vld [vmem:[#allocation9 + $0x38] sm:$0xff] }
 0x66b   :  { %v1845_v38 = vadd.f32 1.0, %v6045_v34  ;;  %v2539_v34 = vld [vmem:[#allocation9 + $0x48] sm:$0xff] }
 0x66c   :  { %6046 = vrcp.f32 %v1835_v36  ;;  %v5815_v36 = vpack.c.bf16 %v2453_v33, %v2452_v30 }
 0x66d   :  { %6048 = vrcp.f32 %v1845_v38 }
 0x676   :  { %v6047_v42 = vpop.eup %6046 }
 0x677   :  { %v6049_v43 = vpop.eup %6048  ;;  %v1851_v41 = vmul.f32 %v6047_v42, %v1849_v40 }
 0x678   :  { %v1858_v44 = vmul.f32 %v6049_v43, %v1856_v37  ;;  %v1854_v46 = vsub.f32 1.0, %v6049_v43 }
 0x679   :  { %v1852_v45 = vadd.f32 %v1851_v41, %v6496_v35 }
 0x67b   :  { %6050 = vtanh.f32 %v1852_v45 }
 0x685   :  { %v6051_v47 = vpop.eup %6050 }
 0x686   :  { %v1855_v48 = vmul.f32 %v6051_v47, %v1854_v46 }
 0x688   :  { %v1859_v49 = vadd.f32 %v1858_v44, %v1855_v48 }
 0x68a   :  { %1860 = vst.msk [vmem:[#allocation2 + $0x8] sm:$0xc] %vm880_vm5, %v1859_v49  ;;  %v1862_v56 = vrot.slane %v1859_v49, 2  ;;  %v2103_v3 = vrot.slane %v1859_v49, 6 }
 0x68c   :  { %5294 = vmatmul.mubr.msk.f32.vlgmr.msra.gmra.mrb[20].mxu1 %vm392_vm3, %v1862_v56  ;;  %5305 = vmatmul.mubr.msk.f32.vlgmr.msra.gmra.mrb[22].mxu0 %vm392_vm3, %v1862_v56 }
 0x68d   :  { %5781 = vmatpush3.bf16.msra.mxu1 %v6462_v21  ;;  %5315 = vmatprep.mubr.msk.f32.mxu1 %vm6304_vm2, %v6305_v19 }
 0x68e   :  { %5782 = vmatprep.subr.bf16.mxu1 %v6303_v12  ;;  %5787 = vmatpush3.bf16.msra.mxu0 %v6439_v9 }
 0x68f   :  { %5788 = vmatprep.subr.bf16.mxu0 %v6303_v12  ;;  %5326 = vmatprep.mubr.msk.f32.mxu0 %vm6304_vm2, %v6305_v19 }
 0x691   :  { %5784 = vmatpush3.bf16.msra.mxu1 %v6470_v24 }
 0x692   :  { %5791 = vmatprep.subr.bf16.mxu1 %v6303_v12  ;;  %5790 = vmatpush3.bf16.msra.mxu0 %v6449_v14 }
 0x693   :  { %5797 = vmatprep.subr.bf16.mxu0 %v6303_v12 }
 0x694   :  { %5316 = vmatmul.mubr.msk.f32.vlgmr.msra.gmra.mrb[22].mxu1 %vm392_vm3, %v1862_v56 }
 0x695   :  { %5793 = vmatpush3.bf16.msra.mxu1 %v6445_v13  ;;  %5337 = vmatprep.mubr.msk.f32.mxu1 %vm6304_vm2, %v6305_v19 }
 0x696   :  { %5794 = vmatprep.subr.bf16.mxu1 %v6303_v12 }
 0x699   :  { %5796 = vmatpush3.bf16.msra.mxu1 %v6458_v20 }
 0x69a   :  { %5804 = vmatprep.subr.bf16.mxu1 %v5803_v25 }
 0x75f   :  { %v1931_v9 = vpop.f32.mrb[20].mxu1  ;;  %v2001_v50 = vpop.f32.mrb[22].mxu0 }
 0x760   :  { %v2076_v51 = vrot.slane %v1931_v9, 4  ;;  %v2086_v53 = vrot.slane %v2001_v50, 4  ;;  %v5295_v54 = vpop.f32.mrb[21].mxu1  ;;  %v5306_v55 = vpop.f32.mrb[23].mxu0 }
 0x762   :  { %v2078_v14 = vadd.f32 %v2076_v51, %v6494_v31  ;;  %v2088_v57 = vadd.f32 %v2086_v53, %v6492_v29 }
 0x764   :  { %v4734_v58 = vmul.f32 -1.442695, %v2078_v14  ;;  %v4735_v59 = vmul.f32 -1.442695, %v2088_v57 }
 0x766   :  { %6052 = vpow2.f32 %v4734_v58 }
 0x767   :  { %6054 = vpow2.f32 %v4735_v59  ;;  %v2071_v13 = vpop.f32.mrb[22].mxu1 }
 0x768   :  { %v5317_v60 = vpop.f32.mrb[23].mxu1  ;;  %v2072_v0 = vadd.f32 %v6507_v52, %v2071_v13 }
 0x76a   :  { %v2096_v1 = vrot.slane %v2072_v0, 4 }
 0x770   :  { %v6053_v61 = vpop.eup %6052 }
 0x771   :  { %v6055_v62 = vpop.eup %6054  ;;  %v2082_v63 = vadd.f32 1.0, %v6053_v61 }
 0x772   :  { %v2092_v20 = vadd.f32 1.0, %v6055_v62  ;;  %v2626_v62 = vld [vmem:[%s7007_s6 + $0x8] sm:$0xff] }
 0x773   :  { %6056 = vrcp.f32 %v2082_v63  ;;  %v2540_v63 = vld [vmem:[#allocation9 + $0x50] sm:$0xff] }
 0x774   :  { %6058 = vrcp.f32 %v2092_v20  ;;  %v2541_v20 = vld [vmem:[#allocation9 + $0x58] sm:$0xff] }
 0x77d   :  { %v6057_v2 = vpop.eup %6056 }
 0x77e   :  { %v6059_v4 = vpop.eup %6058  ;;  %v2098_v5 = vmul.f32 %v6057_v2, %v2096_v1  ;;  %v2627_v1 = vld [vmem:[%s7007_s6 + $0x10] sm:$0xff]  ;;  %v2628_v2 = vld [vmem:[%s7007_s6 + $0x18] sm:$0xff] }
 0x77f   :  { %v2105_v6 = vmul.f32 %v6059_v4, %v2103_v3  ;;  %v2101_v8 = vsub.f32 1.0, %v6059_v4  ;;  %v6711_v4 = vpack.c.bf16 %v2628_v2, %v2627_v1 }
 0x780   :  { %v2099_v7 = vadd.f32 %v2098_v5, %v6496_v35  ;;  %v4752_v5 = vld [vmem:[%s7007_s6 + $0x20] sm:$0xff] }
 0x782   :  { %6060 = vtanh.f32 %v2099_v7  ;;  %v4756_v7 = vld [vmem:[%s7007_s6 + $0x40] sm:$0xff] }
 0x78c   :  { %v6061_v10 = vpop.eup %6060 }
 0x78d   :  { %v2102_v11 = vmul.f32 %v6061_v10, %v2101_v8  ;;  %v4757_v8 = vld [vmem:[%s7007_s6 + $0x48] sm:$0xff] }
 0x78f   :  { %v6668_v15 = vadd.f32 %v2105_v6, %v2102_v11  ;;  %v4753_v6 = vld [vmem:[%s7007_s6 + $0x28] sm:$0xff]  ;;  %v4754_v11 = vld [vmem:[%s7007_s6 + $0x30] sm:$0xff] }
 0x790   :  { %v6731_v10 = vpack.c.bf16 %v4753_v6, %v4752_v5 }
 0x791   :  { %2107 = vst.msk [vmem:[#allocation2 + $0x8] sm:$0x30] %vm1128_vm6, %v6668_v15  ;;  %v2109_v16 = vrot.slane %v6668_v15, 4 }
 0x793   :  { %5327 = vmatmul.mubr.msk.f32.vlgmr.msra.gmra.mrb[24].mxu0 %vm392_vm3, %v2109_v16  ;;  %5338 = vmatmul.mubr.msk.f32.vlgmr.msra.gmra.mrb[24].mxu1 %vm392_vm3, %v2109_v16 }
 0x794   :  { %5799 = vmatpush3.bf16.msra.mxu0 %v6462_v21  ;;  %5359 = vmatprep.mubr.msk.f32.mxu1 %vm392_vm3, %v6675_v17  ;;  %v2451_v21 = vld [vmem:[#allocation9 + $0x28] sm:$0xff] }
 0x795   :  { %5800 = vmatprep.subr.bf16.mxu0 %v6303_v12  ;;  %5348 = vmatprep.mubr.msk.f32.mxu0 %vm6304_vm2, %v6305_v19  ;;  %v5811_v26 = vpack.c.bf16 %v2451_v21, %v2450_v23  ;;  %v4745_v21 = vld [vmem:[%s7008_s7 + $0x1] ss:$0 sm:$0xff] }
 0x796   :  { %5806 = vmatpush3.bf16.msra.mxu1 %v5803_v25  ;;  %v4741_v25 = vld [vmem:[%s7008_s7] ss:$0 sm:$0xff] }
 0x797   :  { %5808 = vmatprep.subr.bf16.mxu1 %v5807_v32 }
 0x798   :  { %5802 = vmatpush3.bf16.msra.mxu0 %v6470_v24  ;;  %v2538_v24 = vld [vmem:[#allocation9 + $0x40] sm:$0xff] }
 0x799   :  { %5812 = vmatprep.subr.bf16.mxu0 %v5811_v26  ;;  %v5819_v38 = vpack.c.bf16 %v2539_v34, %v2538_v24  ;;  %v4749_v24 = vld [vmem:[%s7008_s7 + $0x2] ss:$0 sm:$0xff] }
 0x79a   :  { %5810 = vmatpush3.bf16.msra.mxu1 %v5807_v32 }
 0x79b   :  { %5349 = vmatmul.mubr.msk.f32.vlgmr.msra.gmra.mrb[26].mxu0 %vm392_vm3, %v2109_v16  ;;  %5820 = vmatprep.subr.bf16.mxu1 %v5819_v38  ;;  %v6741_v16 = vpack.c.bf16 %v4757_v8, %v4756_v7 }
 0x79c   :  { %5370 = vmatprep.mubr.msk.f32.mxu0 %vm392_vm3, %v6675_v17  ;;  %5814 = vmatpush3.bf16.msra.mxu0 %v5811_v26 }
 0x79d   :  { %5816 = vmatprep.subr.bf16.mxu0 %v5815_v36 }
 0x7a0   :  { %5818 = vmatpush3.bf16.msra.mxu0 %v5815_v36 }
 0x7a1   :  { %5827 = vmatprep.subr.bf16.mxu0 %v6303_v12 }
 0x866   :  { %v2178_v39 = vpop.f32.mrb[24].mxu0  ;;  %v2248_v40 = vpop.f32.mrb[24].mxu1 }
 0x867   :  { %v2323_v42 = vrot.slane %v2178_v39, 2  ;;  %v2333_v37 = vrot.slane %v2248_v40, 2  ;;  %v5328_v43 = vpop.f32.mrb[25].mxu0  ;;  %v5339_v41 = vpop.f32.mrb[25].mxu1 }
 0x869   :  { %v2325_v44 = vadd.f32 %v2323_v42, %v6494_v31  ;;  %v2335_v45 = vadd.f32 %v2333_v37, %v6492_v29  ;;  %v2350_v31 = vrot.slane %v6668_v15, 6  ;;  %v4755_v15 = vld [vmem:[%s7007_s6 + $0x38] sm:$0xff] }
 0x86a   :  { %v6752_v22 = vpack.c.bf16 %v4755_v15, %v4754_v11 }
 0x86b   :  { %v4739_v46 = vmul.f32 -1.442695, %v2325_v44  ;;  %v4740_v47 = vmul.f32 -1.442695, %v2335_v45 }
 0x86d   :  { %6062 = vpow2.f32 %v4739_v46 }
 0x86e   :  { %6064 = vpow2.f32 %v4740_v47  ;;  %v2318_v48 = vpop.f32.mrb[26].mxu0 }
 0x86f   :  { %v5350_v49 = vpop.f32.mrb[27].mxu0  ;;  %v2319_v53 = vadd.f32 %v6507_v52, %v2318_v48  ;;  %v2625_v52 = vld [vmem:[%s7007_s6] sm:$0xff] }
 0x870   :  { %v6700_v0 = vpack.c.bf16 %v2626_v62, %v2625_v52 }
 0x871   :  { %v2343_v54 = vrot.slane %v2319_v53, 2 }
 0x877   :  { %v6063_v56 = vpop.eup %6062 }
 0x878   :  { %v6065_v9 = vpop.eup %6064  ;;  %v2329_v50 = vadd.f32 1.0, %v6063_v56 }
 0x879   :  { %v2339_v51 = vadd.f32 1.0, %v6065_v9 }
 0x87a   :  { %6066 = vrcp.f32 %v2329_v50  ;;  %v6805_v50 = vld [vmem:[%s7009_s8] ss:$0 sm:$0xff] }
 0x87b   :  { %6068 = vrcp.f32 %v2339_v51 }
 0x884   :  { %v6067_v55 = vpop.eup %6066 }
 0x885   :  { %v6069_v14 = vpop.eup %6068  ;;  %v2345_v29 = vmul.f32 %v6067_v55, %v2343_v54 }
 0x886   :  { %v2352_v57 = vmul.f32 %v6069_v14, %v2350_v31  ;;  %v2348_v59 = vsub.f32 1.0, %v6069_v14 }
 0x887   :  { %v2346_v58 = vadd.f32 %v2345_v29, %v6496_v35  ;;  %v5823_v35 = vpack.c.bf16 %v2541_v20, %v2540_v63 }
 0x889   :  { %6070 = vtanh.f32 %v2346_v58 }
 0x893   :  { %v6071_v13 = vpop.eup %6070 }
 0x894   :  { %v2349_v60 = vmul.f32 %v6071_v13, %v2348_v59 }
 0x896   :  { %v2353_v61 = vadd.f32 %v2352_v57, %v2349_v60 }
 0x898   :  { %2354 = vst.msk [vmem:[#allocation2 + $0x8] sm:$0xc0] %vm1376_vm7, %v2353_v61 }
 0x89f   :  { %v2356_v3 = vld [vmem:[#allocation2 + $0x8] sm:$0xff] }
 0x8a0   :  { %5360 = vmatmul.mubr.msk.f32.vlgmr.msra.gmra.mrb[26].mxu1 %vm392_vm3, %v2356_v3  ;;  %5371 = vmatmul.mubr.msk.f32.vlgmr.msra.gmra.mrb[28].mxu0 %vm392_vm3, %v2356_v3 }
 0x8a1   :  { %5822 = vmatpush3.bf16.msra.mxu1 %v5819_v38  ;;  %5829 = vmatpush3.bf16.msra.mxu0 %v6700_v0 }
 0x8a2   :  { %5381 = vmatprep.mubr.msk.f32.mxu1 %vm392_vm3, %v6675_v17  ;;  %5824 = vmatprep.subr.bf16.mxu1 %v5823_v35  ;;  %v4758_v17 = vld [vmem:[%s7007_s6 + $0x50] sm:$0xff] }
 0x8a3   :  { %5830 = vmatprep.subr.bf16.mxu0 %v6303_v12  ;;  %5392 = vmatprep.mubr.msk.f32.mxu0 %vm6304_vm2, %v6305_v19  ;;  %v6758_v23 = vpack.c.bf16 %v4759_v18, %v4758_v17 }
 0x8a5   :  { %5826 = vmatpush3.bf16.msra.mxu1 %v5823_v35  ;;  %5832 = vmatpush3.bf16.msra.mxu0 %v6711_v4 }
 0x8a6   :  { %5833 = vmatprep.subr.bf16.mxu1 %v6303_v12  ;;  %5839 = vmatprep.subr.bf16.mxu0 %v6303_v12 }
 0x8a8   :  { %5382 = vmatmul.mubr.msk.f32.vlgmr.msra.gmra.mrb[28].mxu1 %vm392_vm3, %v2356_v3  ;;  %5393 = vmatmul.mubr.f32.vlgmr.msra.gmra.mrb[30].mxu0 %v6305_v19 }
 0x8a9   :  { %5835 = vmatpush3.bf16.msra.mxu1 %v6731_v10  ;;  %5403 = vmatprep.mubr.msk.f32.mxu1 %vm6304_vm2, %v6305_v19 }
 0x8aa   :  { %5836 = vmatprep.subr.bf16.mxu1 %v6303_v12  ;;  %5841 = vmatpush3.bf16.msra.mxu0 %v6741_v16 }
 0x8ab   :  { %5842 = vmatprep.subr.bf16.mxu0 %v6303_v12  ;;  %5414 = vmatprep.mubr.msk.f32.mxu0 %vm6304_vm2, %v6305_v19 }
 0x8ad   :  { %5838 = vmatpush3.bf16.msra.mxu1 %v6752_v22 }
 0x8ae   :  { %5844 = vmatpush3.bf16.msra.mxu0 %v6758_v23  ;;  %5845 = vmatprep.subr.bf16.mxu1 %v6303_v12 }
 0x8af   :  { %5851 = vmatprep.subr.bf16.mxu0 %v6303_v12 }
 0x8b0   :  { %5404 = vmatmul.mubr.f32.vlgmr.msra.gmra.mrb[30].mxu1 %v6305_v19 }
 0x8b1   :  { %5415 = vmatmul.mubr.f32.vlgmr.msra.gmra.mrb[32].mxu0 %v6305_v19  ;;  %5847 = vmatpush3.bf16.msra.mxu1 %v6700_v0 }
 0x8b2   :  { %5853 = vmatpush3.bf16.msra.mxu0 %v6731_v10  ;;  %5848 = vmatprep.subr.bf16.mxu1 %v6303_v12 }
 0x8b3   :  { %5854 = vmatprep.subr.bf16.mxu0 %v6303_v12  ;;  %5425 = vmatprep.mubr.msk.f32.mxu1 %vm6304_vm2, %v6305_v19 }
 0x8b4   :  { %5436 = vmatprep.mubr.msk.f32.mxu0 %vm6304_vm2, %v6305_v19 }
 0x8b5   :  { %5850 = vmatpush3.bf16.msra.mxu1 %v6711_v4 }
 0x8b6   :  { %5856 = vmatpush3.bf16.msra.mxu0 %v6752_v22  ;;  %5857 = vmatprep.subr.bf16.mxu1 %v6303_v12 }
 0x8b7   :  { %5863 = vmatprep.subr.bf16.mxu0 %v6303_v12 }
 0x973   :  { %v5361_v26 = vpop.f32.mrb[26].mxu1  ;;  %v5372_v27 = vpop.f32.mrb[28].mxu0 }
 0x974   :  { %v6787_v28 = vadd.f32 %v5361_v26, %v4741_v25  ;;  %v6789_v30 = vadd.f32 %v5372_v27, %v4745_v21  ;;  %v2440_v32 = vpop.f32.mrb[27].mxu1  ;;  %v2528_v33 = vpop.f32.mrb[29].mxu0 }
 0x975   :  { %v6794_v34 = vadd.f32 %v4741_v25, %v2440_v32  ;;  %v6799_v41 = vadd.f32 %v4745_v21, %v2528_v33 }
 0x97b   :  { %v5383_v36 = vpop.f32.mrb[28].mxu1  ;;  %v2706_v38 = vpop.f32.mrb[30].mxu0 }
 0x97c   :  { %v6796_v39 = vadd.f32 %v5383_v36, %v4749_v24  ;;  %v2856_v40 = vadd.f32 %v2706_v38, %v6794_v34  ;;  %v2616_v42 = vpop.f32.mrb[29].mxu1  ;;  %v5394_v37 = vpop.f32.mrb[31].mxu0 }
 0x97d   :  { %v6808_v31 = vadd.f32 %v4749_v24, %v2616_v42 }
 0x97e   :  { %v4761_v43 = vmul.f32 -1.442695, %v2856_v40 }
 0x980   :  { %6072 = vpow2.f32 %v4761_v43 }
 0x983   :  { %v2776_v44 = vpop.f32.mrb[30].mxu1 }
 0x984   :  { %v2863_v45 = vadd.f32 %v2776_v44, %v6799_v41  ;;  %v5405_v46 = vpop.f32.mrb[31].mxu1  ;;  %v2852_v47 = vpop.f32.mrb[32].mxu0 }
 0x985   :  { %v5416_v48 = vpop.f32.mrb[33].mxu0  ;;  %v2853_v54 = vadd.f32 %v6805_v50, %v2852_v47 }
 0x986   :  { %v4762_v49 = vmul.f32 -1.442695, %v2863_v45 }
 0x988   :  { %6074 = vpow2.f32 %v4762_v49 }
 0x98a   :  { %v6073_v56 = vpop.eup %6072 }
 0x98b   :  { %v2860_v9 = vadd.f32 1.0, %v6073_v56 }
 0x98d   :  { %6076 = vrcp.f32 %v2860_v9 }
 0x992   :  { %v6075_v51 = vpop.eup %6074 }
 0x993   :  { %v2867_v53 = vadd.f32 1.0, %v6075_v51 }
 0x995   :  { %6078 = vrcp.f32 %v2867_v53 }
 0x997   :  { %v6077_v55 = vpop.eup %6076 }
 0x998   :  { %v2870_v14 = vmul.f32 %v6077_v55, %v2853_v54 }
 0x99a   :  { %v2871_v29 = vadd.f32 %v2870_v14, %v6808_v31 }
 0x99c   :  { %6080 = vtanh.f32 %v2871_v29 }
 0x99f   :  { %v6079_v57 = vpop.eup %6078 }
 0x9a0   :  { %v2873_v58 = vsub.f32 1.0, %v6079_v57  ;;  %v2875_v60 = vmul.f32 0.0, %v6079_v57 }
 0x9a6   :  { %v6081_v59 = vpop.eup %6080 }
 0x9a7   :  { %v2874_v13 = vmul.f32 %v6081_v59, %v2873_v58 }
 0x9a9   :  { %v2876_v61 = vadd.f32 %v2875_v60, %v2874_v13 }
 0x9ab   :  { %5426 = vmatmul.mubr.msk.f32.vlgmr.msra.gmra.mrb[32].mxu1 %vm392_vm3, %v2876_v61  ;;  %5437 = vmatmul.mubr.msk.f32.vlgmr.msra.gmra.mrb[34].mxu0 %vm392_vm3, %v2876_v61  ;;  %v3118_v27 = vrot.slane %v2876_v61, 6 }
 0x9ac   :  { %5859 = vmatpush3.bf16.msra.mxu1 %v6741_v16  ;;  %5447 = vmatprep.mubr.msk.f32.mxu1 %vm6304_vm2, %v6305_v19 }
 0x9ad   :  { %5860 = vmatprep.subr.bf16.mxu1 %v6303_v12  ;;  %5865 = vmatpush3.bf16.msra.mxu0 %v6700_v0 }
 0x9ae   :  { %5866 = vmatprep.subr.bf16.mxu0 %v6303_v12  ;;  %5458 = vmatprep.mubr.msk.f32.mxu0 %vm6304_vm2, %v6305_v19 }
 0x9b0   :  { %5862 = vmatpush3.bf16.msra.mxu1 %v6758_v23 }
 0x9b1   :  { %5869 = vmatprep.subr.bf16.mxu1 %v6303_v12  ;;  %5868 = vmatpush3.bf16.msra.mxu0 %v6711_v4 }
 0x9b2   :  { %5875 = vmatprep.subr.bf16.mxu0 %v6303_v12 }
 0x9b3   :  { %5448 = vmatmul.mubr.msk.f32.vlgmr.msra.gmra.mrb[34].mxu1 %vm392_vm3, %v2876_v61 }
 0x9b4   :  { %5871 = vmatpush3.bf16.msra.mxu1 %v6731_v10  ;;  %5469 = vmatprep.mubr.msk.f32.mxu1 %vm6304_vm2, %v6305_v19 }
 0x9b5   :  { %5872 = vmatprep.subr.bf16.mxu1 %v6303_v12 }
 0x9b8   :  { %5874 = vmatpush3.bf16.msra.mxu1 %v6752_v22 }
 0x9b9   :  { %5881 = vmatprep.subr.bf16.mxu1 %v6303_v12 }
 0xa7e   :  { %v2946_v52 = vpop.f32.mrb[32].mxu1  ;;  %v3016_v62 = vpop.f32.mrb[34].mxu0 }
 0xa7f   :  { %v3091_v63 = vrot.slane %v2946_v52, 6  ;;  %v3101_v20 = vrot.slane %v3016_v62, 6  ;;  %v5427_v35 = vpop.f32.mrb[33].mxu1  ;;  %v5438_v1 = vpop.f32.mrb[35].mxu0 }
 0xa81   :  { %v3093_v2 = vadd.f32 %v3091_v63, %v6794_v34  ;;  %v3103_v3 = vadd.f32 %v3101_v20, %v6799_v41 }
 0xa83   :  { %v4766_v5 = vmul.f32 -1.442695, %v3093_v2  ;;  %v4767_v6 = vmul.f32 -1.442695, %v3103_v3 }
 0xa85   :  { %6082 = vpow2.f32 %v4766_v5 }
 0xa86   :  { %6084 = vpow2.f32 %v4767_v6  ;;  %v3086_v7 = vpop.f32.mrb[34].mxu1 }
 0xa87   :  { %v5449_v8 = vpop.f32.mrb[35].mxu1  ;;  %v3087_v25 = vadd.f32 %v6805_v50, %v3086_v7 }
 0xa89   :  { %v3111_v21 = vrot.slane %v3087_v25, 6 }
 0xa8f   :  { %v6083_v11 = vpop.eup %6082 }
 0xa90   :  { %v6085_v15 = vpop.eup %6084  ;;  %v3097_v17 = vadd.f32 1.0, %v6083_v11 }
 0xa91   :  { %v3107_v18 = vadd.f32 1.0, %v6085_v15 }
 0xa92   :  { %6086 = vrcp.f32 %v3097_v17 }
 0xa93   :  { %6088 = vrcp.f32 %v3107_v18 }
 0xa9c   :  { %v6087_v26 = vpop.eup %6086 }
 0xa9d   :  { %v6089_v32 = vpop.eup %6088  ;;  %v3113_v33 = vmul.f32 %v6087_v26, %v3111_v21 }
 0xa9e   :  { %v3120_v24 = vmul.f32 %v6089_v32, %v3118_v27  ;;  %v3116_v38 = vsub.f32 1.0, %v6089_v32 }
 0xa9f   :  { %v3114_v36 = vadd.f32 %v3113_v33, %v6808_v31 }
 0xaa1   :  { %6090 = vtanh.f32 %v3114_v36 }
 0xaab   :  { %v6091_v40 = vpop.eup %6090 }
 0xaac   :  { %v3117_v42 = vmul.f32 %v6091_v40, %v3116_v38 }
 0xaae   :  { %v3121_v37 = vadd.f32 %v3120_v24, %v3117_v42 }
 0xab0   :  { %v3123_v43 = vrot.slane %v3121_v37, 2  ;;  %v3364_v61 = vrot.slane %v3121_v37, 6 }
 0xab2   :  { %5459 = vmatmul.mubr.msk.f32.vlgmr.msra.gmra.mrb[36].mxu0 %vm392_vm3, %v3123_v43  ;;  %5470 = vmatmul.mubr.msk.f32.vlgmr.msra.gmra.mrb[36].mxu1 %vm392_vm3, %v3123_v43 }
 0xab3   :  { %5877 = vmatpush3.bf16.msra.mxu0 %v6741_v16  ;;  %5480 = vmatprep.mubr.msk.f32.mxu0 %vm6304_vm2, %v6305_v19 }
 0xab4   :  { %5878 = vmatprep.subr.bf16.mxu0 %v6303_v12  ;;  %5883 = vmatpush3.bf16.msra.mxu1 %v6700_v0 }
 0xab5   :  { %5884 = vmatprep.subr.bf16.mxu1 %v6303_v12  ;;  %5491 = vmatprep.mubr.msk.f32.mxu1 %vm6304_vm2, %v6305_v19 }
 0xab7   :  { %5880 = vmatpush3.bf16.msra.mxu0 %v6758_v23 }
 0xab8   :  { %5887 = vmatprep.subr.bf16.mxu0 %v6303_v12  ;;  %5886 = vmatpush3.bf16.msra.mxu1 %v6711_v4 }
 0xab9   :  { %5893 = vmatprep.subr.bf16.mxu1 %v6303_v12 }
 0xaba   :  { %5481 = vmatmul.mubr.msk.f32.vlgmr.msra.gmra.mrb[38].mxu0 %vm392_vm3, %v3123_v43 }
 0xabb   :  { %5889 = vmatpush3.bf16.msra.mxu0 %v6731_v10  ;;  %5502 = vmatprep.mubr.msk.f32.mxu0 %vm6304_vm2, %v6305_v19 }
 0xabc   :  { %5890 = vmatprep.subr.bf16.mxu0 %v6303_v12 }
 0xabf   :  { %5892 = vmatpush3.bf16.msra.mxu0 %v6752_v22 }
 0xac0   :  { %5899 = vmatprep.subr.bf16.mxu0 %v6303_v12 }
 0xb85   :  { %v3192_v44 = vpop.f32.mrb[36].mxu0  ;;  %v3262_v45 = vpop.f32.mrb[36].mxu1 }
 0xb86   :  { %v3337_v46 = vrot.slane %v3192_v44, 4  ;;  %v3347_v47 = vrot.slane %v3262_v45, 4  ;;  %v5460_v48 = vpop.f32.mrb[37].mxu0  ;;  %v5471_v49 = vpop.f32.mrb[37].mxu1 }
 0xb88   :  { %v3339_v56 = vadd.f32 %v3337_v46, %v6794_v34  ;;  %v3349_v9 = vadd.f32 %v3347_v47, %v6799_v41 }
 0xb8a   :  { %v4771_v51 = vmul.f32 -1.442695, %v3339_v56  ;;  %v4772_v53 = vmul.f32 -1.442695, %v3349_v9 }
 0xb8c   :  { %6092 = vpow2.f32 %v4771_v51 }
 0xb8d   :  { %6094 = vpow2.f32 %v4772_v53  ;;  %v3332_v54 = vpop.f32.mrb[38].mxu0 }
 0xb8e   :  { %v5482_v55 = vpop.f32.mrb[39].mxu0  ;;  %v3333_v59 = vadd.f32 %v6805_v50, %v3332_v54 }
 0xb90   :  { %v3357_v13 = vrot.slane %v3333_v59, 4 }
 0xb96   :  { %v6093_v14 = vpop.eup %6092 }
 0xb97   :  { %v6095_v29 = vpop.eup %6094  ;;  %v3343_v57 = vadd.f32 1.0, %v6093_v14 }
 0xb98   :  { %v3353_v58 = vadd.f32 1.0, %v6095_v29 }
 0xb99   :  { %6096 = vrcp.f32 %v3343_v57 }
 0xb9a   :  { %6098 = vrcp.f32 %v3353_v58 }
 0xba3   :  { %v6097_v60 = vpop.eup %6096 }
 0xba4   :  { %v6099_v52 = vpop.eup %6098  ;;  %v3359_v62 = vmul.f32 %v6097_v60, %v3357_v13 }
 0xba5   :  { %v3366_v63 = vmul.f32 %v6099_v52, %v3364_v61  ;;  %v3362_v35 = vsub.f32 1.0, %v6099_v52 }
 0xba6   :  { %v3360_v20 = vadd.f32 %v3359_v62, %v6808_v31 }
 0xba8   :  { %6100 = vtanh.f32 %v3360_v20 }
 0xbb2   :  { %v6101_v1 = vpop.eup %6100 }
 0xbb3   :  { %v3363_v2 = vmul.f32 %v6101_v1, %v3362_v35 }
 0xbb5   :  { %v3367_v3 = vadd.f32 %v3366_v63, %v3363_v2 }
 0xbb7   :  { %v3369_v5 = vrot.slane %v3367_v3, 4  ;;  %v3610_v43 = vrot.slane %v3367_v3, 6 }
 0xbb9   :  { %5492 = vmatmul.mubr.msk.f32.vlgmr.msra.gmra.mrb[38].mxu1 %vm392_vm3, %v3369_v5  ;;  %5503 = vmatmul.mubr.msk.f32.vlgmr.msra.gmra.mrb[40].mxu0 %vm392_vm3, %v3369_v5 }
 0xbba   :  { %5895 = vmatpush3.bf16.msra.mxu1 %v6741_v16  ;;  %5513 = vmatprep.mubr.msk.f32.mxu1 %vm6304_vm2, %v6305_v19 }
 0xbbb   :  { %5896 = vmatprep.subr.bf16.mxu1 %v6303_v12  ;;  %5901 = vmatpush3.bf16.msra.mxu0 %v6700_v0 }
 0xbbc   :  { %5902 = vmatprep.subr.bf16.mxu0 %v6303_v12  ;;  %5524 = vmatprep.mubr.msk.f32.mxu0 %vm6304_vm2, %v6305_v19 }
 0xbbe   :  { %5898 = vmatpush3.bf16.msra.mxu1 %v6758_v23 }
 0xbbf   :  { %5905 = vmatprep.subr.bf16.mxu1 %v6303_v12  ;;  %5904 = vmatpush3.bf16.msra.mxu0 %v6711_v4 }
 0xbc0   :  { %5911 = vmatprep.subr.bf16.mxu0 %v6303_v12 }
 0xbc1   :  { %5514 = vmatmul.mubr.msk.f32.vlgmr.msra.gmra.mrb[40].mxu1 %vm392_vm3, %v3369_v5 }
 0xbc2   :  { %5907 = vmatpush3.bf16.msra.mxu1 %v6731_v10  ;;  %5535 = vmatprep.mubr.msk.f32.mxu1 %vm6304_vm2, %v6305_v19 }
 0xbc3   :  { %5908 = vmatprep.subr.bf16.mxu1 %v6303_v12 }
 0xbc6   :  { %5910 = vmatpush3.bf16.msra.mxu1 %v6752_v22 }
 0xbc7   :  { %5917 = vmatprep.subr.bf16.mxu1 %v6303_v12 }
 0xc8c   :  { %v3438_v6 = vpop.f32.mrb[38].mxu1  ;;  %v3508_v7 = vpop.f32.mrb[40].mxu0 }
 0xc8d   :  { %v3583_v8 = vrot.slane %v3438_v6, 2  ;;  %v3593_v11 = vrot.slane %v3508_v7, 2  ;;  %v5493_v15 = vpop.f32.mrb[39].mxu1  ;;  %v5504_v17 = vpop.f32.mrb[41].mxu0 }
 0xc8f   :  { %v3585_v18 = vadd.f32 %v3583_v8, %v6794_v34  ;;  %v3595_v25 = vadd.f32 %v3593_v11, %v6799_v41 }
 0xc91   :  { %v4776_v21 = vmul.f32 -1.442695, %v3585_v18  ;;  %v4777_v26 = vmul.f32 -1.442695, %v3595_v25 }
 0xc93   :  { %6102 = vpow2.f32 %v4776_v21 }
 0xc94   :  { %6104 = vpow2.f32 %v4777_v26  ;;  %v3578_v27 = vpop.f32.mrb[40].mxu1 }
 0xc95   :  { %v5515_v32 = vpop.f32.mrb[41].mxu1  ;;  %v3579_v40 = vadd.f32 %v6805_v50, %v3578_v27 }
 0xc97   :  { %v3603_v42 = vrot.slane %v3579_v40, 2 }
 0xc9d   :  { %v6103_v33 = vpop.eup %6102 }
 0xc9e   :  { %v6105_v24 = vpop.eup %6104  ;;  %v3589_v36 = vadd.f32 1.0, %v6103_v33 }
 0xc9f   :  { %v3599_v38 = vadd.f32 1.0, %v6105_v24 }
 0xca0   :  { %6106 = vrcp.f32 %v3589_v36 }
 0xca1   :  { %6108 = vrcp.f32 %v3599_v38 }
 0xcaa   :  { %v6107_v37 = vpop.eup %6106 }
 0xcab   :  { %v6109_v34 = vpop.eup %6108  ;;  %v3605_v44 = vmul.f32 %v6107_v37, %v3603_v42 }
 0xcac   :  { %v3612_v41 = vmul.f32 %v6109_v34, %v3610_v43  ;;  %v3608_v46 = vsub.f32 1.0, %v6109_v34 }
 0xcad   :  { %v3606_v45 = vadd.f32 %v3605_v44, %v6808_v31 }
 0xcaf   :  { %6110 = vtanh.f32 %v3606_v45 }
 0xcb9   :  { %v6111_v47 = vpop.eup %6110 }
 0xcba   :  { %v3609_v48 = vmul.f32 %v6111_v47, %v3608_v46 }
 0xcbc   :  { %v3613_v49 = vadd.f32 %v3612_v41, %v3609_v48 }
 0xcbe   :  { %v3615_v56 = vrot.slane %v3613_v49, 6 }
 0xcc0   :  { %5525 = vmatmul.mubr.msk.f32.vlgmr.msra.gmra.mrb[42].mxu0 %vm392_vm3, %v3615_v56  ;;  %5536 = vmatmul.mubr.msk.f32.vlgmr.msra.gmra.mrb[42].mxu1 %vm392_vm3, %v3615_v56 }
 0xcc1   :  { %5913 = vmatpush3.bf16.msra.mxu0 %v6741_v16  ;;  %5546 = vmatprep.mubr.msk.f32.mxu0 %vm6304_vm2, %v6305_v19 }
 0xcc2   :  { %5914 = vmatprep.subr.bf16.mxu0 %v6303_v12  ;;  %5919 = vmatpush3.bf16.msra.mxu1 %v6700_v0 }
 0xcc3   :  { %5920 = vmatprep.subr.bf16.mxu1 %v6303_v12  ;;  %5557 = vmatprep.mubr.msk.f32.mxu1 %vm6304_vm2, %v6305_v19 }
 0xcc5   :  { %5916 = vmatpush3.bf16.msra.mxu0 %v6758_v23 }
 0xcc6   :  { %5923 = vmatprep.subr.bf16.mxu0 %v6303_v12  ;;  %5922 = vmatpush3.bf16.msra.mxu1 %v6711_v4 }
 0xcc7   :  { %5929 = vmatprep.subr.bf16.mxu1 %v6303_v12 }
 0xcc8   :  { %5547 = vmatmul.mubr.msk.f32.vlgmr.msra.gmra.mrb[44].mxu0 %vm392_vm3, %v3615_v56 }
 0xcc9   :  { %5925 = vmatpush3.bf16.msra.mxu0 %v6731_v10  ;;  %5568 = vmatprep.mubr.msk.f32.mxu0 %vm6304_vm2, %v6305_v19 }
 0xcca   :  { %5926 = vmatprep.subr.bf16.mxu0 %v6303_v12 }
 0xccd   :  { %5928 = vmatpush3.bf16.msra.mxu0 %v6752_v22 }
 0xcce   :  { %5935 = vmatprep.subr.bf16.mxu0 %v6303_v12 }
 0xd93   :  { %v3684_v31 = vpop.f32.mrb[42].mxu0  ;;  %v3754_v9 = vpop.f32.mrb[42].mxu1 }
 0xd94   :  { %v3828_v51 = vadd.f32 %v3684_v31, %v6787_v28  ;;  %v5526_v53 = vpop.f32.mrb[43].mxu0  ;;  %v5537_v54 = vpop.f32.mrb[43].mxu1  ;;  %v3835_v14 = vadd.f32 %v3754_v9, %v6789_v30 }
 0xd96   :  { %v4781_v55 = vmul.f32 -1.442695, %v3828_v51  ;;  %v4782_v29 = vmul.f32 -1.442695, %v3835_v14 }
 0xd98   :  { %6112 = vpow2.f32 %v4781_v55 }
 0xd99   :  { %6114 = vpow2.f32 %v4782_v29 }
 0xd9b   :  { %v3824_v57 = vpop.f32.mrb[44].mxu0 }
 0xd9c   :  { %v5548_v58 = vpop.f32.mrb[45].mxu0  ;;  %v3825_v52 = vadd.f32 %v6805_v50, %v3824_v57 }
 0xda2   :  { %v6113_v59 = vpop.eup %6112 }
 0xda3   :  { %v3832_v13 = vadd.f32 1.0, %v6113_v59  ;;  %v6115_v60 = vpop.eup %6114 }
 0xda4   :  { %v3839_v61 = vadd.f32 1.0, %v6115_v60 }
 0xda5   :  { %6116 = vrcp.f32 %v3832_v13 }
 0xda6   :  { %6118 = vrcp.f32 %v3839_v61 }
 0xdaf   :  { %v6117_v62 = vpop.eup %6116 }
 0xdb0   :  { %v3842_v63 = vmul.f32 %v6117_v62, %v3825_v52  ;;  %v6119_v35 = vpop.eup %6118 }
 0xdb1   :  { %v3845_v1 = vsub.f32 1.0, %v6119_v35  ;;  %v3848_v5 = vmul.f32 %v6119_v35, %v3615_v56 }
 0xdb2   :  { %v3843_v20 = vadd.f32 %v3842_v63, %v6796_v39 }
 0xdb4   :  { %6120 = vtanh.f32 %v3843_v20 }
 0xdbe   :  { %v6121_v2 = vpop.eup %6120 }
 0xdbf   :  { %v3846_v3 = vmul.f32 %v6121_v2, %v3845_v1 }
 0xdc1   :  { %v3849_v6 = vadd.f32 %v3848_v5, %v3846_v3 }
 0xdc3   :  { %5558 = vmatmul.mubr.msk.f32.vlgmr.msra.gmra.mrb[44].mxu1 %vm392_vm3, %v3849_v6  ;;  %5569 = vmatmul.mubr.msk.f32.vlgmr.msra.gmra.mrb[46].mxu0 %vm392_vm3, %v3849_v6  ;;  %v4091_v34 = vrot.slane %v3849_v6, 6 }
 0xdc4   :  { %5931 = vmatpush3.bf16.msra.mxu1 %v6741_v16  ;;  %5579 = vmatprep.mubr.msk.f32.mxu1 %vm6304_vm2, %v6305_v19 }
 0xdc5   :  { %5932 = vmatprep.subr.bf16.mxu1 %v6303_v12  ;;  %5937 = vmatpush3.bf16.msra.mxu0 %v6700_v0 }
 0xdc6   :  { %5938 = vmatprep.subr.bf16.mxu0 %v6303_v12  ;;  %5590 = vmatprep.mubr.msk.f32.mxu0 %vm6304_vm2, %v6305_v19 }
 0xdc8   :  { %5934 = vmatpush3.bf16.msra.mxu1 %v6758_v23 }
 0xdc9   :  { %5941 = vmatprep.subr.bf16.mxu1 %v6303_v12  ;;  %5940 = vmatpush3.bf16.msra.mxu0 %v6711_v4 }
 0xdca   :  { %5947 = vmatprep.subr.bf16.mxu0 %v6303_v12 }
 0xdcb   :  { %5580 = vmatmul.mubr.msk.f32.vlgmr.msra.gmra.mrb[46].mxu1 %vm392_vm3, %v3849_v6 }
 0xdcc   :  { %5943 = vmatpush3.bf16.msra.mxu1 %v6731_v10  ;;  %5601 = vmatprep.mubr.msk.f32.mxu1 %vm6304_vm2, %v6305_v19 }
 0xdcd   :  { %5944 = vmatprep.subr.bf16.mxu1 %v6303_v12 }
 0xdd0   :  { %5946 = vmatpush3.bf16.msra.mxu1 %v6752_v22 }
 0xdd1   :  { %5953 = vmatprep.subr.bf16.mxu1 %v6303_v12 }
 0xe96   :  { %v3919_v7 = vpop.f32.mrb[44].mxu1  ;;  %v3989_v8 = vpop.f32.mrb[46].mxu0 }
 0xe97   :  { %v4064_v11 = vrot.slane %v3919_v7, 6  ;;  %v4074_v15 = vrot.slane %v3989_v8, 6  ;;  %v5559_v17 = vpop.f32.mrb[45].mxu1  ;;  %v5570_v18 = vpop.f32.mrb[47].mxu0 }
 0xe99   :  { %v4066_v25 = vadd.f32 %v4064_v11, %v6787_v28  ;;  %v4076_v21 = vadd.f32 %v4074_v15, %v6789_v30  ;;  %v4587_v11 = vld [vmem:[%s7010_s9] sm:$0xff]  ;;  %v4589_v15 = vld [vmem:[%s7010_s9 + $0x10] sm:$0xff] }
 0xe9b   :  { %v4786_v26 = vmul.f32 -1.442695, %v4066_v25  ;;  %v4787_v27 = vmul.f32 -1.442695, %v4076_v21 }
 0xe9d   :  { %6122 = vpow2.f32 %v4786_v26 }
 0xe9e   :  { %6124 = vpow2.f32 %v4787_v27  ;;  %v4059_v32 = vpop.f32.mrb[46].mxu1 }
 0xe9f   :  { %v5581_v33 = vpop.f32.mrb[47].mxu1  ;;  %v4060_v42 = vadd.f32 %v6805_v50, %v4059_v32 }
 0xea1   :  { %v4084_v37 = vrot.slane %v4060_v42, 6 }
 0xea7   :  { %v6123_v24 = vpop.eup %6122 }
 0xea8   :  { %v6125_v36 = vpop.eup %6124  ;;  %v4070_v38 = vadd.f32 1.0, %v6123_v24 }
 0xea9   :  { %v4080_v40 = vadd.f32 1.0, %v6125_v36 }
 0xeaa   :  { %6126 = vrcp.f32 %v4070_v38 }
 0xeab   :  { %6128 = vrcp.f32 %v4080_v40 }
 0xeb4   :  { %v6127_v43 = vpop.eup %6126 }
 0xeb5   :  { %v6129_v44 = vpop.eup %6128  ;;  %v4086_v41 = vmul.f32 %v6127_v43, %v4084_v37 }
 0xeb6   :  { %v4093_v45 = vmul.f32 %v6129_v44, %v4091_v34  ;;  %v4089_v47 = vsub.f32 1.0, %v6129_v44 }
 0xeb7   :  { %v4087_v46 = vadd.f32 %v4086_v41, %v6796_v39 }
 0xeb9   :  { %6130 = vtanh.f32 %v4087_v46 }
 0xec3   :  { %v6131_v48 = vpop.eup %6130 }
 0xec4   :  { %v4090_v49 = vmul.f32 %v6131_v48, %v4089_v47 }
 0xec6   :  { %v4094_v56 = vadd.f32 %v4093_v45, %v4090_v49 }
 0xec8   :  { %v4096_v31 = vrot.slane %v4094_v56, 2  ;;  %v4337_v63 = vrot.slane %v4094_v56, 6 }
 0xeca   :  { %5591 = vmatmul.mubr.msk.f32.vlgmr.msra.gmra.mrb[48].mxu0 %vm392_vm3, %v4096_v31  ;;  %5602 = vmatmul.mubr.msk.f32.vlgmr.msra.gmra.mrb[48].mxu1 %vm392_vm3, %v4096_v31 }
 0xecb   :  { %5949 = vmatpush3.bf16.msra.mxu0 %v6741_v16  ;;  %5612 = vmatprep.mubr.msk.f32.mxu0 %vm6304_vm2, %v6305_v19 }
 0xecc   :  { %5950 = vmatprep.subr.bf16.mxu0 %v6303_v12  ;;  %5955 = vmatpush3.bf16.msra.mxu1 %v6700_v0 }
 0xecd   :  { %5956 = vmatprep.subr.bf16.mxu1 %v6303_v12  ;;  %5623 = vmatprep.mubr.msk.f32.mxu1 %vm6304_vm2, %v6305_v19 }
 0xecf   :  { %5952 = vmatpush3.bf16.msra.mxu0 %v6758_v23 }
 0xed0   :  { %5959 = vmatprep.subr.bf16.mxu0 %v6303_v12  ;;  %5958 = vmatpush3.bf16.msra.mxu1 %v6711_v4 }
 0xed1   :  { %5965 = vmatprep.subr.bf16.mxu1 %v6303_v12 }
 0xed2   :  { %5613 = vmatmul.mubr.msk.f32.vlgmr.msra.gmra.mrb[50].mxu0 %vm392_vm3, %v4096_v31 }
 0xed3   :  { %5961 = vmatpush3.bf16.msra.mxu0 %v6731_v10  ;;  %5634 = vmatprep.mubr.msk.f32.mxu0 %vm6304_vm2, %v6305_v19 }
 0xed4   :  { %5962 = vmatprep.subr.bf16.mxu0 %v6303_v12 }
 0xed7   :  { %5964 = vmatpush3.bf16.msra.mxu0 %v6752_v22 }
 0xed8   :  { %5971 = vmatprep.subr.bf16.mxu0 %v6303_v12 }
 0xf9d   :  { %v4165_v0 = vpop.f32.mrb[48].mxu0  ;;  %v4235_v9 = vpop.f32.mrb[48].mxu1 }
 0xf9e   :  { %v4310_v51 = vrot.slane %v4165_v0, 4  ;;  %v4320_v53 = vrot.slane %v4235_v9, 4  ;;  %v5592_v4 = vpop.f32.mrb[49].mxu0  ;;  %v5603_v54 = vpop.f32.mrb[49].mxu1 }
 0xfa0   :  { %v4312_v55 = vadd.f32 %v4310_v51, %v6787_v28  ;;  %v4322_v14 = vadd.f32 %v4320_v53, %v6789_v30  ;;  %v4798_v51 = vld [vmem:[#allocation11] ss:$0 sm:$0xff] }
 0xfa2   :  { %v4791_v10 = vmul.f32 -1.442695, %v4312_v55  ;;  %v4792_v29 = vmul.f32 -1.442695, %v4322_v14 }
 0xfa4   :  { %6132 = vpow2.f32 %v4791_v10 }
 0xfa5   :  { %6134 = vpow2.f32 %v4792_v29  ;;  %v4305_v57 = vpop.f32.mrb[50].mxu0 }
 0xfa6   :  { %v5614_v58 = vpop.f32.mrb[51].mxu0  ;;  %v4306_v61 = vadd.f32 %v6805_v50, %v4305_v57 }
 0xfa8   :  { %v4330_v52 = vrot.slane %v4306_v61, 4 }
 0xfae   :  { %v6133_v59 = vpop.eup %6132 }
 0xfaf   :  { %v6135_v22 = vpop.eup %6134  ;;  %v4316_v13 = vadd.f32 1.0, %v6133_v59 }
 0xfb0   :  { %v4326_v60 = vadd.f32 1.0, %v6135_v22 }
 0xfb1   :  { %6136 = vrcp.f32 %v4316_v13 }
 0xfb2   :  { %6138 = vrcp.f32 %v4326_v60 }
 0xfbb   :  { %v6137_v62 = vpop.eup %6136 }
 0xfbc   :  { %v6139_v20 = vpop.eup %6138  ;;  %v4332_v35 = vmul.f32 %v6137_v62, %v4330_v52 }
 0xfbd   :  { %v4339_v1 = vmul.f32 %v6139_v20, %v4337_v63  ;;  %v4335_v3 = vsub.f32 1.0, %v6139_v20 }
 0xfbe   :  { %v4333_v2 = vadd.f32 %v4332_v35, %v6796_v39 }
 0xfc0   :  { %6140 = vtanh.f32 %v4333_v2 }
 0xfca   :  { %v6141_v5 = vpop.eup %6140 }
 0xfcb   :  { %v4336_v6 = vmul.f32 %v6141_v5, %v4335_v3 }
 0xfcd   :  { %v4340_v7 = vadd.f32 %v4339_v1, %v4336_v6 }
 0xfcf   :  { %v4342_v8 = vrot.slane %v4340_v7, 4  ;;  %v4583_v46 = vrot.slane %v4340_v7, 6 }
 0xfd1   :  { %5624 = vmatmul.mubr.msk.f32.vlgmr.msra.gmra.mrb[50].mxu1 %vm392_vm3, %v4342_v8  ;;  %5635 = vmatmul.mubr.msk.f32.vlgmr.msra.gmra.mrb[52].mxu0 %vm392_vm3, %v4342_v8 }
 0xfd2   :  { %5967 = vmatpush3.bf16.msra.mxu1 %v6741_v16  ;;  %5645 = vmatprep.mubr.msk.f32.mxu1 %vm6304_vm2, %v6305_v19  ;;  %v4588_v16 = vld [vmem:[%s7010_s9 + $0x8] sm:$0xff] }
 0xfd3   :  { %5968 = vmatprep.subr.bf16.mxu1 %v6303_v12  ;;  %5656 = vmatprep.mubr.msk.f32.mxu0 %vm6304_vm2, %v6305_v19  ;;  %v5972_v17 = vpack.c.bf16 %v4588_v16, %v4587_v11  ;;  %v4590_v19 = vld [vmem:[%s7010_s9 + $0x18] sm:$0xff]  ;;  %s6306_s9 = smov [#allocation12]  }
 0xfd4   :  { %s4680_s27 = sshll.u32 %s6306_s9, 4  ;;  %s4681_s27 = int_to_ptr.vmem [resolvable:$true] %s4680_s27 }
 0xfd5   :  { %5973 = vmatpush3.bf16.msra.mxu0 %v5972_v17  ;;  %s6262_s28 = scalar_lea.vmem %s4681_s27, 32  ;;  %p6267_p13 = scmp.lt.s32.totalorder %s4681_s27, %s4681_s27 }
 0xfd6   :  { %5970 = vmatpush3.bf16.msra.mxu1 %v6758_v23  ;;  %v5975_v23 = vpack.c.bf16 %v4590_v19, %v4589_v15  ;;  %5974 = vmatprep.subr.bf16.mxu0 %v6303_v12  ;;  %p6263_p12 = scmp.ne.s32.totalorder %s4681_s27, %s6262_s28  ;;  %p6268_p0 = scmp.lt.s32.totalorder %s6262_s28, %s6262_s28 }
 0xfd8   :  { %p6269_p1 = por %p6268_p0, %p6267_p13 }
 0xfd9   :  { %5646 = vmatmul.mubr.msk.f32.vlgmr.msra.gmra.mrb[52].mxu1 %vm392_vm3, %v4342_v8  ;;  %5976 = vmatpush3.bf16.msra.mxu0 %v5975_v23 }
 0xfda   :  { %p6270_p2 = pnand %p6269_p1, %p6263_p12 }
0x10a4   :  { %v4411_v18 = vpop.f32.mrb[50].mxu1  ;;  %v4481_v25 = vpop.f32.mrb[52].mxu0 }
0x10a5   :  { %v4556_v21 = vrot.slane %v4411_v18, 2  ;;  %v4566_v26 = vrot.slane %v4481_v25, 2  ;;  %v5625_v27 = vpop.f32.mrb[51].mxu1  ;;  %v5636_v32 = vpop.f32.mrb[53].mxu0 }
0x10a7   :  { %v4558_v33 = vadd.f32 %v4556_v21, %v6787_v28  ;;  %v4568_v24 = vadd.f32 %v4566_v26, %v6789_v30 }
0x10a9   :  { %v4796_v36 = vmul.f32 -1.442695, %v4558_v33  ;;  %v4797_v38 = vmul.f32 -1.442695, %v4568_v24 }
0x10ab   :  { %6142 = vpow2.f32 %v4796_v36 }
0x10ac   :  { %6144 = vpow2.f32 %v4797_v38  ;;  %v4551_v40 = vpop.f32.mrb[52].mxu1 }
0x10ad   :  { %v5647_v42 = vpop.f32.mrb[53].mxu1  ;;  %v4552_v44 = vadd.f32 %v6805_v50, %v4551_v40 }
0x10af   :  { %v4576_v41 = vrot.slane %v4552_v44, 2 }
0x10b5   :  { %v6143_v37 = vpop.eup %6142 }
0x10b6   :  { %v6145_v43 = vpop.eup %6144  ;;  %v4562_v12 = vadd.f32 1.0, %v6143_v37 }
0x10b7   :  { %v4572_v34 = vadd.f32 1.0, %v6145_v43 }
0x10b8   :  { %6146 = vrcp.f32 %v4562_v12 }
0x10b9   :  { %6148 = vrcp.f32 %v4572_v34 }
0x10c2   :  { %v6147_v45 = vpop.eup %6146 }
0x10c3   :  { %v6149_v28 = vpop.eup %6148  ;;  %v4578_v47 = vmul.f32 %v6147_v45, %v4576_v41 }
0x10c4   :  { %v4585_v30 = vmul.f32 %v6149_v28, %v4583_v46  ;;  %v4581_v49 = vsub.f32 1.0, %v6149_v28 }
0x10c5   :  { %v4579_v48 = vadd.f32 %v4578_v47, %v6796_v39 }
0x10c7   :  { %6150 = vtanh.f32 %v4579_v48 }
0x10d1   :  { %v6151_v56 = vpop.eup %6150 }
0x10d2   :  { %v4582_v31 = vmul.f32 %v6151_v56, %v4581_v49 }
0x10d4   :  { %v4586_v0 = vadd.f32 %v4585_v30, %v4582_v31 }
0x10d6   :  { %v4599_v9 = vrot.slane %v4586_v0, 6 }
0x10d8   :  { %5657 = vmatmul.mubr.msk.f32.vlgmr.msra.gmra.mrb[54].mxu0 %vm392_vm3, %v4599_v9 }
0x11ab   :  { %v4668_v50 = vpop.f32.mrb[54].mxu0 }
0x11ac   :  { %v4669_v53 = vadd.f32 %v4798_v51, %v4668_v50  ;;  %v5658_v4 = vpop.f32.mrb[55].mxu0 }
0x11ae   :  { %4673 = vst.msk [vmem:[#allocation12] sm:$0x3] %vm4672_vm8, %v4669_v53 }
0x11af   :  { %6273 = shalt.err (!%p6270_p2)
}
0x11b0   :  { %s6274_s21 = scalar_lea.hbm %s7012_s11, 32 }
0x11b1   :  { %p6275_p3 = scmp.ne.s32.totalorder %s7012_s11, %s6274_s21  ;;  %p6278_p4 = scmp.lt.u32.totalorder %s6274_s21, %s7012_s11 }
0x11b3   :  { %p6280_p5 = pnand %p6278_p4, %p6275_p3 }
0x11b5   :  { %6283 = shalt.err (!%p6280_p5)
}
0x11b6   :  { %4683 = dma.vmem_to_hbm [thread:$0]  %s4681_s27, 32, %s7012_s11, [#allocation5]  }
0x11b7   :  { %6290 = dma.done.wait [#allocation5], 32  }
0x11b8   :  { %6291 = vsyncadd [#allocation5], 4294967264 }
0x11b9   :  { %4687 = vsyncpa [#allocation4], 1 }
0x11ba   :  { %4688 = vsyncpa [#allocation7], 1 }
0x11bb   :  { %4689 = vsyncpa [#allocation10], 1 }
0x11bc   :  { %4690 = vsyncpa [#allocation5], 1 }

</bundles_post_ra>
